<compile_context>
chip_gen: v7x
topology: tpu7x:2x2x1
jax: 0.10.0
libtpu: 0.0.40
codegen_flags: <defaults>
</compile_context>

<pallas_src>
import functools

import jax
import jax.numpy as jnp
from jax.experimental import pallas as pl
from jax.experimental.pallas import tpu as pltpu


# ------------------------------ tiling helper ------------------------------

def _tile(dim, pref, align):
    """Pick a tile for `dim`: `pref` if it divides `dim`, else the largest
    multiple of `align` <= pref that divides `dim`, else the full dim."""
    if dim <= pref:
        return dim
    t = pref
    while t >= align:
        if dim % t == 0:
            return t
        t -= align
    return dim


# ------------------------------ Pallas kernels ------------------------------

def _act_quant_kernel(x_ref, q_ref, s_ref):
    """BitLinear prologue: RMSNorm (eps=1e-5, no affine) + per-row absmax int8
    fake-quant. Emits the integer grid values (bf16, exact) and the per-row
    dequant scale 1/s."""
    x = x_ref[...].astype(jnp.float32)                              # (tm, D)
    xn = x * jax.lax.rsqrt(jnp.mean(x * x, axis=-1, keepdims=True) + 1e-5)
    amax = jnp.maximum(jnp.max(jnp.abs(xn), axis=-1, keepdims=True), 1e-5)
    q = jnp.clip(jnp.round(xn * (127.0 / amax)), -128.0, 127.0)
    q_ref[...] = q.astype(q_ref.dtype)                              # ints in bf16
    s_ref[...] = amax * (1.0 / 127.0)                               # = 1/s


def _bitlinear_matmul_kernel(xq_ref, wq_ref, sc_ref, o_ref, acc_ref):
    """Tiled integer-grid matmul; per-row combined (act * weight) dequant
    scale applied in the finalize step."""
    @pl.when(pl.program_id(2) == 0)
    def _():
        acc_ref[...] = jnp.zeros_like(acc_ref)

    acc_ref[...] += jax.lax.dot_general(
        xq_ref[...], wq_ref[...],
        dimension_numbers=(((1,), (1,)), ((), ())),                 # NT matmul
        preferred_element_type=jnp.float32)

    @pl.when(pl.program_id(2) == pl.num_programs(2) - 1)
    def _():
        o_ref[...] = (acc_ref[...] * sc_ref[...]).astype(o_ref.dtype)


def _swiglu_ff_kernel(xq_ref, w1_ref, w3_ref, s1_ref, s3_ref, o_ref,
                      acc1_ref, acc3_ref):
    """Fused w1/w3 BitLinear matmuls + SwiGLU combine: silu(x@W1^T)*(x@W3^T)."""
    @pl.when(pl.program_id(2) == 0)
    def _():
        acc1_ref[...] = jnp.zeros_like(acc1_ref)
        acc3_ref[...] = jnp.zeros_like(acc3_ref)

    dn = (((1,), (1,)), ((), ()))
    x = xq_ref[...]
    acc1_ref[...] += jax.lax.dot_general(x, w1_ref[...], dn,
                                         preferred_element_type=jnp.float32)
    acc3_ref[...] += jax.lax.dot_general(x, w3_ref[...], dn,
                                         preferred_element_type=jnp.float32)

    @pl.when(pl.program_id(2) == pl.num_programs(2) - 1)
    def _():
        a = acc1_ref[...] * s1_ref[...]
        b = acc3_ref[...] * s3_ref[...]
        o_ref[...] = (a * jax.nn.sigmoid(a) * b).astype(o_ref.dtype)


def _flash_attn_kernel(q_ref, k_ref, v_ref, o_ref, m_sc, l_sc, acc_sc,
                       *, tq, tkv, scale):
    """Causal flash attention (online softmax) for one (batch*head), tiled
    over the KV axis with causal block-skip."""
    qi = pl.program_id(1)
    kv = pl.program_id(2)

    @pl.when(kv == 0)
    def _():
        m_sc[...] = jnp.full_like(m_sc, -jnp.inf)
        l_sc[...] = jnp.zeros_like(l_sc)
        acc_sc[...] = jnp.zeros_like(acc_sc)

    # Skip KV blocks that are entirely in the causal future of this Q tile.
    @pl.when(kv * tkv <= (qi + 1) * tq - 1)
    def _():
        q = q_ref[0].astype(jnp.float32)                            # (tq, Dh)
        k = k_ref[0].astype(jnp.float32)                            # (tkv, Dh)
        v = v_ref[0].astype(jnp.float32)
        s = jax.lax.dot_general(q, k, (((1,), (1,)), ((), ())),
                                preferred_element_type=jnp.float32) * scale
        row = qi * tq + jax.lax.broadcasted_iota(jnp.int32, (tq, tkv), 0)
        col = kv * tkv + jax.lax.broadcasted_iota(jnp.int32, (tq, tkv), 1)
        s = jnp.where(col <= row, s, -1e30)

        m_prev = m_sc[...]
        m_new = jnp.maximum(m_prev, jnp.max(s, axis=-1, keepdims=True))
        alpha = jnp.exp(m_prev - m_new)
        p = jnp.exp(s - m_new)
        l_sc[...] = alpha * l_sc[...] + jnp.sum(p, axis=-1, keepdims=True)
        acc_sc[...] = alpha * acc_sc[...] + jnp.dot(
            p, v, preferred_element_type=jnp.float32)
        m_sc[...] = m_new

    @pl.when(kv == pl.num_programs(2) - 1)
    def _():
        inv_l = pl.reciprocal(l_sc[...], approx=True)
        o_ref[0] = (acc_sc[...] * inv_l).astype(o_ref.dtype)


def _norm_vocab_kernel(x_ref, g_ref, w_ref, o_ref, *, eps):
    """Final affine RMSNorm + tied vocab projection (embedding kept (V, D))."""
    x = x_ref[...].astype(jnp.float32)                              # (tm, D)
    g = g_ref[...]                                                  # (1, D)
    xn = x * jax.lax.rsqrt(jnp.mean(x * x, axis=-1, keepdims=True) + eps) * g
    o_ref[...] = jax.lax.dot_general(
        xn, w_ref[...], (((1,), (1,)), ((), ())),                   # (tm, tn)
        preferred_element_type=jnp.float32)


# ------------------------------ kernel wrappers -----------------------------

def act_quant(x2d):
    """x2d: (M, D) -> (qint (M, D) bf16, inv_s (M, 1) f32)."""
    M, D = x2d.shape
    tm = _tile(M, 256, 8)
    return pl.pallas_call(
        _act_quant_kernel,
        grid=(M // tm,),
        out_shape=(jax.ShapeDtypeStruct((M, D), jnp.bfloat16),
                   jax.ShapeDtypeStruct((M, 1), jnp.float32)),
        in_specs=[pl.BlockSpec((tm, D), lambda i: (i, 0))],
        out_specs=(pl.BlockSpec((tm, D), lambda i: (i, 0)),
                   pl.BlockSpec((tm, 1), lambda i: (i, 0))),
        compiler_params=pltpu.CompilerParams(dimension_semantics=("parallel",)),
    )(x2d)


def quantize_weight(w):
    """Ternary BitNet weight fake-quant, hoisted out of the matmul kernel.
    Returns integer-grid values (bf16, exact) and the global dequant scale."""
    w_dq = jnp.maximum(jnp.mean(jnp.abs(w)), 1e-5)                  # = 1/ws
    w_int = jnp.clip(jnp.round(w / w_dq), -1.0, 1.0).astype(jnp.bfloat16)
    return w_int, w_dq


def bitlinear_matmul(xq, inv_s, w_int, w_scale):
    """xq: (M, K) bf16 ints, inv_s: (M, 1), w_int: (N, K) bf16 ternary,
    w_scale: scalar. Returns (M, N) f32."""
    M, K = xq.shape
    N = w_int.shape[0]
    sc = (inv_s * w_scale).astype(jnp.float32)                      # (M, 1)
    tm = _tile(M, 256, 8)
    tn = _tile(N, 512, 128)
    tk = _tile(K, 1024, 128)
    return pl.pallas_call(
        _bitlinear_matmul_kernel,
        grid=(M // tm, N // tn, K // tk),
        out_shape=jax.ShapeDtypeStruct((M, N), jnp.float32),
        in_specs=[pl.BlockSpec((tm, tk), lambda i, j, k: (i, k)),
                  pl.BlockSpec((tn, tk), lambda i, j, k: (j, k)),
                  pl.BlockSpec((tm, 1), lambda i, j, k: (i, 0))],
        out_specs=pl.BlockSpec((tm, tn), lambda i, j, k: (i, j)),
        scratch_shapes=[pltpu.VMEM((tm, tn), jnp.float32)],
        compiler_params=pltpu.CompilerParams(
            dimension_semantics=("parallel", "parallel", "arbitrary")),
    )(xq, w_int, sc)


def swiglu_ff(xq, inv_s, w1_int, w1_scale, w3_int, w3_scale):
    """Fused silu(x@W1^T) * (x@W3^T) over quantized operands. -> (M, Hd) f32."""
    M, K = xq.shape
    Hd = w1_int.shape[0]
    s1 = (inv_s * w1_scale).astype(jnp.float32)
    s3 = (inv_s * w3_scale).astype(jnp.float32)
    tm = _tile(M, 256, 8)
    tn = _tile(Hd, 512, 128)
    tk = _tile(K, 1024, 128)
    return pl.pallas_call(
        _swiglu_ff_kernel,
        grid=(M // tm, Hd // tn, K // tk),
        out_shape=jax.ShapeDtypeStruct((M, Hd), jnp.float32),
        in_specs=[pl.BlockSpec((tm, tk), lambda i, j, k: (i, k)),
                  pl.BlockSpec((tn, tk), lambda i, j, k: (j, k)),
                  pl.BlockSpec((tn, tk), lambda i, j, k: (j, k)),
                  pl.BlockSpec((tm, 1), lambda i, j, k: (i, 0)),
                  pl.BlockSpec((tm, 1), lambda i, j, k: (i, 0))],
        out_specs=pl.BlockSpec((tm, tn), lambda i, j, k: (i, j)),
        scratch_shapes=[pltpu.VMEM((tm, tn), jnp.float32),
                        pltpu.VMEM((tm, tn), jnp.float32)],
        compiler_params=pltpu.CompilerParams(
            dimension_semantics=("parallel", "parallel", "arbitrary")),
    )(xq, w1_int, w3_int, s1, s3)


def flash_attention(q, k, v):
    """q, k, v: (B*H, S, Dh) f32 -> (B*H, S, Dh) f32, causal."""
    BH, S, Dh = q.shape
    tq = _tile(S, 256, 8)
    tkv = _tile(S, 512, 8)
    kernel = functools.partial(_flash_attn_kernel, tq=tq, tkv=tkv,
                               scale=1.0 / (Dh ** 0.5))
    q_spec = pl.BlockSpec((1, tq, Dh), lambda b, qi, ki: (b, qi, 0))
    kv_spec = pl.BlockSpec((1, tkv, Dh), lambda b, qi, ki: (b, ki, 0))
    return pl.pallas_call(
        kernel,
        grid=(BH, S // tq, S // tkv),
        out_shape=jax.ShapeDtypeStruct((BH, S, Dh), jnp.float32),
        in_specs=[q_spec, kv_spec, kv_spec],
        out_specs=q_spec,
        scratch_shapes=[pltpu.VMEM((tq, 1), jnp.float32),
                        pltpu.VMEM((tq, 1), jnp.float32),
                        pltpu.VMEM((tq, Dh), jnp.float32)],
        compiler_params=pltpu.CompilerParams(
            dimension_semantics=("parallel", "parallel", "arbitrary")),
    )(q, k, v)


def norm_vocab_proj(x2d, g, embed):
    """Final RMSNorm (affine, eps=1e-6) + tied vocab projection.
    x2d: (M, D), g: (1, D), embed: (V, D) -> (M, V)."""
    M, D = x2d.shape
    V = embed.shape[0]
    tm = _tile(M, 128, 8)
    tn = _tile(V, 256, 128)
    return pl.pallas_call(
        functools.partial(_norm_vocab_kernel, eps=1e-6),
        grid=(M // tm, V // tn),
        out_shape=jax.ShapeDtypeStruct((M, V), jnp.float32),
        in_specs=[pl.BlockSpec((tm, D), lambda i, j: (i, 0)),
                  pl.BlockSpec((1, D), lambda i, j: (0, 0)),
                  pl.BlockSpec((tn, D), lambda i, j: (j, 0))],
        out_specs=pl.BlockSpec((tm, tn), lambda i, j: (i, j)),
        compiler_params=pltpu.CompilerParams(
            dimension_semantics=("parallel", "parallel")),
    )(x2d, g, embed)


# ---------------------- JAX glue (RoPE, embedding, wiring) ------------------

def precompute_freqs_cis(dim, end, theta=10000.0):
    freqs = 1.0 / (theta ** (jnp.arange(0, dim, 2, dtype=jnp.float32)[: dim // 2] / dim))
    t = jnp.arange(end, dtype=jnp.float32)
    angles = jnp.outer(t, freqs)                                    # (end, dim//2)
    return jnp.cos(angles), jnp.sin(angles)


def apply_rotary_emb(xq, xk, cos, sin):
    # (B, S, H, Dh); (even, odd) interleaved pairs = complex parts, matching
    # torch.view_as_complex(x.reshape(..., -1, 2)).
    def rot(x):
        xr = x[..., 0::2]
        xi = x[..., 1::2]
        c = cos[None, :, None, :]
        s = sin[None, :, None, :]
        yr = xr * c - xi * s
        yi = xr * s + xi * c
        return jnp.stack([yr, yi], axis=-1).reshape(x.shape)
    return rot(xq), rot(xk)


def transformer_forward(params, tokens, *, num_heads):
    B, S = tokens.shape
    D = params["embed"].shape[1]
    H = num_heads
    Dh = D // H

    x = params["embed"][tokens]                                     # (B, S, D)
    cos = params["cos"][:S]
    sin = params["sin"][:S]

    for layer in params["layers"]:
        # ---------------- attention (attn_norm = Identity) ----------------
        h2d = x.reshape(B * S, D)
        # Shared BitLinear prologue for q/k/v (same input -> computed once).
        xq_int, x_inv_s = act_quant(h2d)
        wq_int, wq_sc = quantize_weight(layer["wq"])
        wk_int, wk_sc = quantize_weight(layer["wk"])
        wv_int, wv_sc = quantize_weight(layer["wv"])
        q = bitlinear_matmul(xq_int, x_inv_s, wq_int, wq_sc).reshape(B, S, H, Dh)
        k = bitlinear_matmul(xq_int, x_inv_s, wk_int, wk_sc).reshape(B, S, H, Dh)
        v = bitlinear_matmul(xq_int, x_inv_s, wv_int, wv_sc).reshape(B, S, H, Dh)
        q, k = apply_rotary_emb(q, k, cos, sin)
        q = q.transpose(0, 2, 1, 3).reshape(B * H, S, Dh)
        k = k.transpose(0, 2, 1, 3).reshape(B * H, S, Dh)
        v = v.transpose(0, 2, 1, 3).reshape(B * H, S, Dh)
        attn = flash_attention(q, k, v)                             # (B*H, S, Dh)
        attn = attn.reshape(B, H, S, Dh).transpose(0, 2, 1, 3).reshape(B * S, D)
        a_int, a_inv_s = act_quant(attn)
        wo_int, wo_sc = quantize_weight(layer["wo"])
        x = x + bitlinear_matmul(a_int, a_inv_s, wo_int, wo_sc).reshape(B, S, D)

        # ---------------- feed forward (ff_norm = Identity) ----------------
        h2d = x.reshape(B * S, D)
        h_int, h_inv_s = act_quant(h2d)                             # shared for w1/w3
        w1_int, w1_sc = quantize_weight(layer["w1"])
        w3_int, w3_sc = quantize_weight(layer["w3"])
        g = swiglu_ff(h_int, h_inv_s, w1_int, w1_sc, w3_int, w3_sc)  # (B*S, 4D)
        g_int, g_inv_s = act_quant(g)
        w2_int, w2_sc = quantize_weight(layer["w2"])
        x = x + bitlinear_matmul(g_int, g_inv_s, w2_int, w2_sc).reshape(B, S, D)

    # final RMSNorm + tied vocab projection (vocab_proj.weight == embed.weight)
    logits = norm_vocab_proj(x.reshape(B * S, D), params["norm_g"], params["embed"])
    return logits.reshape(B, S, -1)


def init_params(key, vocab_size, hidden, num_heads, num_layers, seq_len):
    n_keys = 1 + num_layers * 7
    keys = jax.random.split(key, n_keys)
    scale = 0.02
    embed = jax.random.normal(keys[0], (vocab_size, hidden), jnp.float32) * scale
    layers = []
    ki = 1
    for _ in range(num_layers):
        layer = {}
        for name, shp in [("wq", (hidden, hidden)), ("wk", (hidden, hidden)),
                          ("wv", (hidden, hidden)), ("wo", (hidden, hidden)),
                          ("w1", (4 * hidden, hidden)), ("w3", (4 * hidden, hidden)),
                          ("w2", (hidden, 4 * hidden))]:
            layer[name] = jax.random.normal(keys[ki], shp, jnp.float32) * scale
            ki += 1
        layers.append(layer)
    cos, sin = precompute_freqs_cis(hidden // num_heads, seq_len * 2)
    return {
        "embed": embed,
        "layers": layers,
        "cos": cos,
        "sin": sin,
        "norm_g": jnp.ones((1, hidden), jnp.float32),
    }


if __name__ == "__main__":
    # small config consistent with the module:
    # vocab=64, hidden=32, heads=4 (head_dim=8), layers=2, seq_len=8, batch=2
    B, S = 2, 8
    vocab, hidden, heads, n_layers = 64, 32, 4, 2

    params = init_params(jax.random.PRNGKey(0), vocab, hidden, heads, n_layers, S)
    tokens = jax.random.randint(jax.random.PRNGKey(1), (B, S), 0, vocab, dtype=jnp.int32)

    fwd = jax.jit(functools.partial(transformer_forward, num_heads=heads))
    logits = fwd(params, tokens)
    jax.block_until_ready(logits)

    assert logits.shape == (B, S, vocab)
    assert bool(jnp.all(jnp.isfinite(logits)))
    print("KERNEL_OK")
</pallas_src>

<mosaic_0001>
module attributes {stable_mosaic.version = 11 : i64} {
  func.func @_bitlinear_matmul_kernel(%arg0: i32, %arg1: i32, %arg2: i32, %arg3: memref<16x32xbf16, #tpu.memory_space<vmem>>, %arg4: memref<32x32xbf16, #tpu.memory_space<vmem>>, %arg5: memref<16x1xf32, #tpu.memory_space<vmem>>, %arg6: memref<16x32xf32, #tpu.memory_space<vmem>>, %arg7: memref<16x32xf32, #tpu.memory_space<vmem>>) attributes {dimension_semantics = [#tpu.dimension_semantics<parallel>, #tpu.dimension_semantics<parallel>, #tpu.dimension_semantics<arbitrary>], iteration_bounds = array<i64: 1, 1, 1>, scalar_prefetch = 0 : i64, scratch_operands = 1 : i64, tpu.core_type = #tpu.core_type<tc>, window_params = [{transform_indices = @transform_0, window_bounds = array<i64: 16, 32>}, {transform_indices = @transform_1, window_bounds = array<i64: 32, 32>}, {transform_indices = @transform_2, window_bounds = array<i64: 16, 1>}, {transform_indices = @transform_3, window_bounds = array<i64: 16, 32>}]} {
    %c0_i32 = arith.constant 0 : i32
    %0 = arith.cmpi eq, %arg2, %c0_i32 : i32
    %1 = arith.extui %0 : i1 to i32
    %c0_i32_0 = arith.constant 0 : i32
    %2 = arith.cmpi ne, %1, %c0_i32_0 : i32
    scf.if %2 {
      %cst_10 = arith.constant 0.000000e+00 : f32
      %12 = vector.broadcast %cst_10 : f32 to vector<16x32xf32>
      %c0_11 = arith.constant 0 : index
      %c0_12 = arith.constant 0 : index
      %13 = vector.load %arg7[%c0_11, %c0_12] : memref<16x32xf32, #tpu.memory_space<vmem>>, vector<16x32xf32>
      tpu.vector_store %arg7[%c0_11, %c0_12], %12 {strides = array<i32>} : memref<16x32xf32, #tpu.memory_space<vmem>>, vector<16x32xf32>,
    } else {
    }
    %c0 = arith.constant 0 : index
    %c0_1 = arith.constant 0 : index
    %3 = vector.load %arg7[%c0, %c0_1] : memref<16x32xf32, #tpu.memory_space<vmem>>, vector<16x32xf32>
    %c0_2 = arith.constant 0 : index
    %c0_3 = arith.constant 0 : index
    %4 = vector.load %arg3[%c0_2, %c0_3] : memref<16x32xbf16, #tpu.memory_space<vmem>>, vector<16x32xbf16>
    %c0_4 = arith.constant 0 : index
    %c0_5 = arith.constant 0 : index
    %5 = vector.load %arg4[%c0_4, %c0_5] : memref<32x32xbf16, #tpu.memory_space<vmem>>, vector<32x32xbf16>
    %cst = arith.constant dense<0.000000e+00> : vector<16x32xf32>
    %6 = tpu.matmul %4, %5, %cst {dimension_numbers = #tpu.dot_dimension_numbers<[1], [1], [0], [0], [0, 0, 1, 0], [], []>} : vector<16x32xbf16>, vector<32x32xbf16>, vector<16x32xf32> -> vector<16x32xf32>
    %7 = arith.addf %3, %6 : vector<16x32xf32>
    %c0_6 = arith.constant 0 : index
    %c0_7 = arith.constant 0 : index
    %8 = vector.load %arg7[%c0_6, %c0_7] : memref<16x32xf32, #tpu.memory_space<vmem>>, vector<16x32xf32>
    tpu.vector_store %arg7[%c0_6, %c0_7], %7 {strides = array<i32>} : memref<16x32xf32, #tpu.memory_space<vmem>>, vector<16x32xf32>,
    %c0_i32_8 = arith.constant 0 : i32
    %9 = arith.cmpi eq, %arg2, %c0_i32_8 : i32
    %10 = arith.extui %9 : i1 to i32
    %c0_i32_9 = arith.constant 0 : i32
    %11 = arith.cmpi ne, %10, %c0_i32_9 : i32
    scf.if %11 {
      %c0_10 = arith.constant 0 : index
      %c0_11 = arith.constant 0 : index
      %12 = vector.load %arg7[%c0_10, %c0_11] : memref<16x32xf32, #tpu.memory_space<vmem>>, vector<16x32xf32>
      %c0_12 = arith.constant 0 : index
      %c0_13 = arith.constant 0 : index
      %13 = vector.load %arg5[%c0_12, %c0_13] : memref<16x1xf32, #tpu.memory_space<vmem>>, vector<16x1xf32>
      %14 = vector.broadcast %13 : vector<16x1xf32> to vector<16x32xf32>
      %15 = arith.mulf %12, %14 : vector<16x32xf32>
      %c0_14 = arith.constant 0 : index
      %c0_15 = arith.constant 0 : index
      %16 = vector.load %arg6[%c0_14, %c0_15] : memref<16x32xf32, #tpu.memory_space<vmem>>, vector<16x32xf32>
      tpu.vector_store %arg6[%c0_14, %c0_15], %15 {strides = array<i32>} : memref<16x32xf32, #tpu.memory_space<vmem>>, vector<16x32xf32>,
    } else {
    }
    return
  }
  func.func @transform_0(%arg0: i32, %arg1: i32, %arg2: i32) -> (i32, i32) {
    %c0_i32 = arith.constant 0 : i32
    return %arg0, %arg2 : i32, i32
  }
  func.func @transform_1(%arg0: i32, %arg1: i32, %arg2: i32) -> (i32, i32) {
    %c0_i32 = arith.constant 0 : i32
    return %arg1, %arg2 : i32, i32
  }
  func.func @transform_2(%arg0: i32, %arg1: i32, %arg2: i32) -> (i32, i32) {
    %c0_i32 = arith.constant 0 : i32
    %c0_i32_0 = arith.constant 0 : i32
    return %arg0, %c0_i32 : i32, i32
  }
  func.func @transform_3(%arg0: i32, %arg1: i32, %arg2: i32) -> (i32, i32) {
    %c0_i32 = arith.constant 0 : i32
    return %arg0, %arg1 : i32, i32
  }
}

module attributes {stable_mosaic.version = 11 : i64} {
  func.func @_act_quant_kernel(%arg0: i32, %arg1: memref<16x32xf32, #tpu.memory_space<vmem>>, %arg2: memref<16x32xbf16, #tpu.memory_space<vmem>>, %arg3: memref<16x1xf32, #tpu.memory_space<vmem>>) attributes {dimension_semantics = [#tpu.dimension_semantics<parallel>], iteration_bounds = array<i64: 1>, scalar_prefetch = 0 : i64, scratch_operands = 0 : i64, tpu.core_type = #tpu.core_type<tc>, window_params = [{transform_indices = @transform_0, window_bounds = array<i64: 16, 32>}, {transform_indices = @transform_1, window_bounds = array<i64: 16, 32>}, {transform_indices = @transform_2, window_bounds = array<i64: 16, 1>}]} {
    %c0 = arith.constant 0 : index
    %c0_0 = arith.constant 0 : index
    %0 = vector.load %arg1[%c0, %c0_0] : memref<16x32xf32, #tpu.memory_space<vmem>>, vector<16x32xf32>
    %1 = arith.mulf %0, %0 : vector<16x32xf32>
    %cst = arith.constant dense<0.000000e+00> : vector<16xf32>
    %2 = vector.multi_reduction <add>, %1, %cst [1] : vector<16x32xf32> to vector<16xf32>
    %3 = vector.shape_cast %2 : vector<16xf32> to vector<16x1xf32>
    %cst_1 = arith.constant 3.200000e+01 : f32
    %4 = vector.broadcast %cst_1 : f32 to vector<16x1xf32>
    %5 = arith.divf %3, %4 : vector<16x1xf32>
    %cst_2 = arith.constant 9.99999974E-6 : f32
    %6 = vector.broadcast %cst_2 : f32 to vector<16x1xf32>
    %7 = arith.addf %5, %6 : vector<16x1xf32>
    %8 = math.rsqrt %7 : vector<16x1xf32>
    %9 = vector.broadcast %8 : vector<16x1xf32> to vector<16x32xf32>
    %10 = arith.mulf %0, %9 : vector<16x32xf32>
    %11 = math.absf %10 : vector<16x32xf32>
    %cst_3 = arith.constant dense<0xFF800000> : vector<16xf32>
    %12 = vector.multi_reduction <maximumf>, %11, %cst_3 [1] : vector<16x32xf32> to vector<16xf32>
    %13 = vector.shape_cast %12 : vector<16xf32> to vector<16x1xf32>
    %cst_4 = arith.constant 9.99999974E-6 : f32
    %14 = vector.broadcast %cst_4 : f32 to vector<16x1xf32>
    %15 = arith.maximumf %13, %14 : vector<16x1xf32>
    %cst_5 = arith.constant 1.270000e+02 : f32
    %16 = vector.broadcast %cst_5 : f32 to vector<16x1xf32>
    %17 = arith.divf %16, %15 : vector<16x1xf32>
    %18 = vector.broadcast %17 : vector<16x1xf32> to vector<16x32xf32>
    %19 = arith.mulf %10, %18 : vector<16x32xf32>
    %20 = math.roundeven %19 : vector<16x32xf32>
    %cst_6 = arith.constant -1.280000e+02 : f32
    %cst_7 = arith.constant 1.270000e+02 : f32
    %21 = vector.broadcast %cst_6 : f32 to vector<16x32xf32>
    %22 = arith.maximumf %21, %20 : vector<16x32xf32>
    %23 = vector.broadcast %cst_7 : f32 to vector<16x32xf32>
    %24 = arith.minimumf %23, %22 : vector<16x32xf32>
    %25 = arith.truncf %24 : vector<16x32xf32> to vector<16x32xbf16>
    %c0_8 = arith.constant 0 : index
    %c0_9 = arith.constant 0 : index
    %26 = vector.load %arg2[%c0_8, %c0_9] : memref<16x32xbf16, #tpu.memory_space<vmem>>, vector<16x32xbf16>
    tpu.vector_store %arg2[%c0_8, %c0_9], %25 {strides = array<i32>} : memref<16x32xbf16, #tpu.memory_space<vmem>>, vector<16x32xbf16>,
    %cst_10 = arith.constant 0.00787401571 : f32
    %27 = vector.broadcast %cst_10 : f32 to vector<16x1xf32>
    %28 = arith.mulf %15, %27 : vector<16x1xf32>
    %c0_11 = arith.constant 0 : index
    %c0_12 = arith.constant 0 : index
    %29 = vector.load %arg3[%c0_11, %c0_12] : memref<16x1xf32, #tpu.memory_space<vmem>>, vector<16x1xf32>
    tpu.vector_store %arg3[%c0_11, %c0_12], %28 {strides = array<i32>} : memref<16x1xf32, #tpu.memory_space<vmem>>, vector<16x1xf32>,
    return
  }
  func.func @transform_0(%arg0: i32) -> (i32, i32) {
    %c0_i32 = arith.constant 0 : i32
    %c0_i32_0 = arith.constant 0 : i32
    return %arg0, %c0_i32 : i32, i32
  }
  func.func @transform_1(%arg0: i32) -> (i32, i32) {
    %c0_i32 = arith.constant 0 : i32
    %c0_i32_0 = arith.constant 0 : i32
    return %arg0, %c0_i32 : i32, i32
  }
  func.func @transform_2(%arg0: i32) -> (i32, i32) {
    %c0_i32 = arith.constant 0 : i32
    %c0_i32_0 = arith.constant 0 : i32
    return %arg0, %c0_i32 : i32, i32
  }
}

module attributes {stable_mosaic.version = 11 : i64} {
  func.func @_flash_attn_kernel(%arg0: i32, %arg1: i32, %arg2: i32, %arg3: memref<1x8x8xf32, #tpu.memory_space<vmem>>, %arg4: memref<1x8x8xf32, #tpu.memory_space<vmem>>, %arg5: memref<1x8x8xf32, #tpu.memory_space<vmem>>, %arg6: memref<1x8x8xf32, #tpu.memory_space<vmem>>, %arg7: memref<8x1xf32, #tpu.memory_space<vmem>>, %arg8: memref<8x1xf32, #tpu.memory_space<vmem>>, %arg9: memref<8x8xf32, #tpu.memory_space<vmem>>) attributes {dimension_semantics = [#tpu.dimension_semantics<parallel>, #tpu.dimension_semantics<parallel>, #tpu.dimension_semantics<arbitrary>], iteration_bounds = array<i64: 8, 1, 1>, scalar_prefetch = 0 : i64, scratch_operands = 3 : i64, tpu.core_type = #tpu.core_type<tc>, window_params = [{transform_indices = @transform_0, window_bounds = array<i64: 1, 8, 8>}, {transform_indices = @transform_1, window_bounds = array<i64: 1, 8, 8>}, {transform_indices = @transform_2, window_bounds = array<i64: 1, 8, 8>}, {transform_indices = @transform_3, window_bounds = array<i64: 1, 8, 8>}]} {
    %c0_i32 = arith.constant 0 : i32
    %0 = arith.cmpi eq, %arg2, %c0_i32 : i32
    %1 = arith.extui %0 : i1 to i32
    %c0_i32_0 = arith.constant 0 : i32
    %2 = arith.cmpi ne, %1, %c0_i32_0 : i32
    scf.if %2 {
      %cst = arith.constant 0xFF800000 : f32
      %13 = vector.broadcast %cst : f32 to vector<8x1xf32>
      %c0 = arith.constant 0 : index
      %c0_6 = arith.constant 0 : index
      %14 = vector.load %arg7[%c0, %c0_6] : memref<8x1xf32, #tpu.memory_space<vmem>>, vector<8x1xf32>
      tpu.vector_store %arg7[%c0, %c0_6], %13 {strides = array<i32>} : memref<8x1xf32, #tpu.memory_space<vmem>>, vector<8x1xf32>,
      %cst_7 = arith.constant 0.000000e+00 : f32
      %15 = vector.broadcast %cst_7 : f32 to vector<8x1xf32>
      %c0_8 = arith.constant 0 : index
      %c0_9 = arith.constant 0 : index
      %16 = vector.load %arg8[%c0_8, %c0_9] : memref<8x1xf32, #tpu.memory_space<vmem>>, vector<8x1xf32>
      tpu.vector_store %arg8[%c0_8, %c0_9], %15 {strides = array<i32>} : memref<8x1xf32, #tpu.memory_space<vmem>>, vector<8x1xf32>,
      %cst_10 = arith.constant 0.000000e+00 : f32
      %17 = vector.broadcast %cst_10 : f32 to vector<8x8xf32>
      %c0_11 = arith.constant 0 : index
      %c0_12 = arith.constant 0 : index
      %18 = vector.load %arg9[%c0_11, %c0_12] : memref<8x8xf32, #tpu.memory_space<vmem>>, vector<8x8xf32>
      tpu.vector_store %arg9[%c0_11, %c0_12], %17 {strides = array<i32>} : memref<8x8xf32, #tpu.memory_space<vmem>>, vector<8x8xf32>,
    } else {
    }
    %c8_i32 = arith.constant 8 : i32
    %3 = arith.muli %arg2, %c8_i32 : i32
    %c1_i32 = arith.constant 1 : i32
    %4 = arith.addi %arg1, %c1_i32 : i32
    %c8_i32_1 = arith.constant 8 : i32
    %5 = arith.muli %4, %c8_i32_1 : i32
    %c1_i32_2 = arith.constant 1 : i32
    %6 = arith.subi %5, %c1_i32_2 : i32
    %7 = arith.cmpi sle, %3, %6 : i32
    %8 = arith.extui %7 : i1 to i32
    %c0_i32_3 = arith.constant 0 : i32
    %9 = arith.cmpi ne, %8, %c0_i32_3 : i32
    scf.if %9 {
      %c0 = arith.constant 0 : index
      %c0_6 = arith.constant 0 : index
      %c0_7 = arith.constant 0 : index
      %13 = vector.load %arg3[%c0, %c0_6, %c0_7] : memref<1x8x8xf32, #tpu.memory_space<vmem>>, vector<1x8x8xf32>
      %14 = vector.shape_cast %13 : vector<1x8x8xf32> to vector<8x8xf32>
      %c0_8 = arith.constant 0 : index
      %c0_9 = arith.constant 0 : index
      %c0_10 = arith.constant 0 : index
      %15 = vector.load %arg4[%c0_8, %c0_9, %c0_10] : memref<1x8x8xf32, #tpu.memory_space<vmem>>, vector<1x8x8xf32>
      %16 = vector.shape_cast %15 : vector<1x8x8xf32> to vector<8x8xf32>
      %c0_11 = arith.constant 0 : index
      %c0_12 = arith.constant 0 : index
      %c0_13 = arith.constant 0 : index
      %17 = vector.load %arg5[%c0_11, %c0_12, %c0_13] : memref<1x8x8xf32, #tpu.memory_space<vmem>>, vector<1x8x8xf32>
      %18 = vector.shape_cast %17 : vector<1x8x8xf32> to vector<8x8xf32>
      %cst = arith.constant dense<0.000000e+00> : vector<8x8xf32>
      %19 = tpu.matmul %14, %16, %cst {dimension_numbers = #tpu.dot_dimension_numbers<[1], [1], [0], [0], [0, 0, 1, 0], [], []>} : vector<8x8xf32>, vector<8x8xf32>, vector<8x8xf32> -> vector<8x8xf32>
      %cst_14 = arith.constant 0.353553385 : f32
      %20 = vector.broadcast %cst_14 : f32 to vector<8x8xf32>
      %21 = arith.mulf %19, %20 : vector<8x8xf32>
      %c8_i32_15 = arith.constant 8 : i32
      %22 = arith.muli %arg1, %c8_i32_15 : i32
      %23 = tpu.iota {dimensions = array<i32: 0>} : vector<8x8xi32>
      %24 = vector.broadcast %22 : i32 to vector<8x8xi32>
      %25 = arith.addi %24, %23 : vector<8x8xi32>
      %c8_i32_16 = arith.constant 8 : i32
      %26 = arith.muli %arg2, %c8_i32_16 : i32
      %27 = tpu.iota {dimensions = array<i32: 1>} : vector<8x8xi32>
      %28 = vector.broadcast %26 : i32 to vector<8x8xi32>
      %29 = arith.addi %28, %27 : vector<8x8xi32>
      %30 = arith.cmpi sle, %29, %25 : vector<8x8xi32>
      %cst_17 = arith.constant -1.000000e+30 : f32
      %31 = vector.broadcast %cst_17 : f32 to vector<8x8xf32>
      %32 = arith.select %30, %21, %31 : vector<8x8xi1>, vector<8x8xf32>
      %c0_18 = arith.constant 0 : index
      %c0_19 = arith.constant 0 : index
      %33 = vector.load %arg7[%c0_18, %c0_19] : memref<8x1xf32, #tpu.memory_space<vmem>>, vector<8x1xf32>
      %cst_20 = arith.constant dense<0xFF800000> : vector<8xf32>
      %34 = vector.multi_reduction <maximumf>, %32, %cst_20 [1] : vector<8x8xf32> to vector<8xf32>
      %35 = vector.shape_cast %34 : vector<8xf32> to vector<8x1xf32>
      %36 = arith.maximumf %33, %35 : vector<8x1xf32>
      %37 = arith.subf %33, %36 : vector<8x1xf32>
      %38 = math.exp %37 : vector<8x1xf32>
      %39 = vector.broadcast %36 : vector<8x1xf32> to vector<8x8xf32>
      %40 = arith.subf %32, %39 : vector<8x8xf32>
      %41 = math.exp %40 : vector<8x8xf32>
      %c0_21 = arith.constant 0 : index
      %c0_22 = arith.constant 0 : index
      %42 = vector.load %arg8[%c0_21, %c0_22] : memref<8x1xf32, #tpu.memory_space<vmem>>, vector<8x1xf32>
      %43 = arith.mulf %38, %42 : vector<8x1xf32>
      %cst_23 = arith.constant dense<0.000000e+00> : vector<8xf32>
      %44 = vector.multi_reduction <add>, %41, %cst_23 [1] : vector<8x8xf32> to vector<8xf32>
      %45 = vector.shape_cast %44 : vector<8xf32> to vector<8x1xf32>
      %46 = arith.addf %43, %45 : vector<8x1xf32>
      %c0_24 = arith.constant 0 : index
      %c0_25 = arith.constant 0 : index
      %47 = vector.load %arg8[%c0_24, %c0_25] : memref<8x1xf32, #tpu.memory_space<vmem>>, vector<8x1xf32>
      tpu.vector_store %arg8[%c0_24, %c0_25], %46 {strides = array<i32>} : memref<8x1xf32, #tpu.memory_space<vmem>>, vector<8x1xf32>,
      %c0_26 = arith.constant 0 : index
      %c0_27 = arith.constant 0 : index
      %48 = vector.load %arg9[%c0_26, %c0_27] : memref<8x8xf32, #tpu.memory_space<vmem>>, vector<8x8xf32>
      %49 = vector.broadcast %38 : vector<8x1xf32> to vector<8x8xf32>
      %50 = arith.mulf %49, %48 : vector<8x8xf32>
      %cst_28 = arith.constant dense<0.000000e+00> : vector<8x8xf32>
      %51 = tpu.matmul %41, %18, %cst_28 {dimension_numbers = #tpu.dot_dimension_numbers<[1], [0], [0], [1], [0, 0, 1, 1], [], []>} : vector<8x8xf32>, vector<8x8xf32>, vector<8x8xf32> -> vector<8x8xf32>
      %52 = arith.addf %50, %51 : vector<8x8xf32>
      %c0_29 = arith.constant 0 : index
      %c0_30 = arith.constant 0 : index
      %53 = vector.load %arg9[%c0_29, %c0_30] : memref<8x8xf32, #tpu.memory_space<vmem>>, vector<8x8xf32>
      tpu.vector_store %arg9[%c0_29, %c0_30], %52 {strides = array<i32>} : memref<8x8xf32, #tpu.memory_space<vmem>>, vector<8x8xf32>,
      %c0_31 = arith.constant 0 : index
      %c0_32 = arith.constant 0 : index
      %54 = vector.load %arg7[%c0_31, %c0_32] : memref<8x1xf32, #tpu.memory_space<vmem>>, vector<8x1xf32>
      tpu.vector_store %arg7[%c0_31, %c0_32], %36 {strides = array<i32>} : memref<8x1xf32, #tpu.memory_space<vmem>>, vector<8x1xf32>,
    } else {
    }
    %c0_i32_4 = arith.constant 0 : i32
    %10 = arith.cmpi eq, %arg2, %c0_i32_4 : i32
    %11 = arith.extui %10 : i1 to i32
    %c0_i32_5 = arith.constant 0 : i32
    %12 = arith.cmpi ne, %11, %c0_i32_5 : i32
    scf.if %12 {
      %c0 = arith.constant 0 : index
      %c0_6 = arith.constant 0 : index
      %13 = vector.load %arg8[%c0, %c0_6] : memref<8x1xf32, #tpu.memory_space<vmem>>, vector<8x1xf32>
      %14 = tpu.reciprocal %13 {approx = true} : vector<8x1xf32> -> vector<8x1xf32>
      %c0_7 = arith.constant 0 : index
      %c0_8 = arith.constant 0 : index
      %15 = vector.load %arg9[%c0_7, %c0_8] : memref<8x8xf32, #tpu.memory_space<vmem>>, vector<8x8xf32>
      %16 = vector.broadcast %14 : vector<8x1xf32> to vector<8x8xf32>
      %17 = arith.mulf %15, %16 : vector<8x8xf32>
      %c0_9 = arith.constant 0 : index
      %c0_10 = arith.constant 0 : index
      %c0_11 = arith.constant 0 : index
      %18 = vector.load %arg6[%c0_9, %c0_10, %c0_11] : memref<1x8x8xf32, #tpu.memory_space<vmem>>, vector<1x8x8xf32>
      %19 = vector.shape_cast %18 : vector<1x8x8xf32> to vector<8x8xf32>
      %20 = vector.shape_cast %17 : vector<8x8xf32> to vector<1x8x8xf32>
      tpu.vector_store %arg6[%c0_9, %c0_10, %c0_11], %20 {strides = array<i32>} : memref<1x8x8xf32, #tpu.memory_space<vmem>>, vector<1x8x8xf32>,
    } else {
    }
    return
  }
  func.func @transform_0(%arg0: i32, %arg1: i32, %arg2: i32) -> (i32, i32, i32) {
    %c0_i32 = arith.constant 0 : i32
    %c0_i32_0 = arith.constant 0 : i32
    return %arg0, %arg1, %c0_i32 : i32, i32, i32
  }
  func.func @transform_1(%arg0: i32, %arg1: i32, %arg2: i32) -> (i32, i32, i32) {
    %c0_i32 = arith.constant 0 : i32
    %c0_i32_0 = arith.constant 0 : i32
    return %arg0, %arg2, %c0_i32 : i32, i32, i32
  }
  func.func @transform_2(%arg0: i32, %arg1: i32, %arg2: i32) -> (i32, i32, i32) {
    %c0_i32 = arith.constant 0 : i32
    %c0_i32_0 = arith.constant 0 : i32
    return %arg0, %arg2, %c0_i32 : i32, i32, i32
  }
  func.func @transform_3(%arg0: i32, %arg1: i32, %arg2: i32) -> (i32, i32, i32) {
    %c0_i32 = arith.constant 0 : i32
    %c0_i32_0 = arith.constant 0 : i32
    return %arg0, %arg1, %c0_i32 : i32, i32, i32
  }
}

module attributes {stable_mosaic.version = 11 : i64} {
  func.func @_act_quant_kernel(%arg0: i32, %arg1: memref<16x128xf32, #tpu.memory_space<vmem>>, %arg2: memref<16x128xbf16, #tpu.memory_space<vmem>>, %arg3: memref<16x1xf32, #tpu.memory_space<vmem>>) attributes {dimension_semantics = [#tpu.dimension_semantics<parallel>], iteration_bounds = array<i64: 1>, scalar_prefetch = 0 : i64, scratch_operands = 0 : i64, tpu.core_type = #tpu.core_type<tc>, window_params = [{transform_indices = @transform_0, window_bounds = array<i64: 16, 128>}, {transform_indices = @transform_1, window_bounds = array<i64: 16, 128>}, {transform_indices = @transform_2, window_bounds = array<i64: 16, 1>}]} {
    %c0 = arith.constant 0 : index
    %c0_0 = arith.constant 0 : index
    %0 = vector.load %arg1[%c0, %c0_0] : memref<16x128xf32, #tpu.memory_space<vmem>>, vector<16x128xf32>
    %1 = arith.mulf %0, %0 : vector<16x128xf32>
    %cst = arith.constant dense<0.000000e+00> : vector<16xf32>
    %2 = vector.multi_reduction <add>, %1, %cst [1] : vector<16x128xf32> to vector<16xf32>
    %3 = vector.shape_cast %2 : vector<16xf32> to vector<16x1xf32>
    %cst_1 = arith.constant 1.280000e+02 : f32
    %4 = vector.broadcast %cst_1 : f32 to vector<16x1xf32>
    %5 = arith.divf %3, %4 : vector<16x1xf32>
    %cst_2 = arith.constant 9.99999974E-6 : f32
    %6 = vector.broadcast %cst_2 : f32 to vector<16x1xf32>
    %7 = arith.addf %5, %6 : vector<16x1xf32>
    %8 = math.rsqrt %7 : vector<16x1xf32>
    %9 = vector.broadcast %8 : vector<16x1xf32> to vector<16x128xf32>
    %10 = arith.mulf %0, %9 : vector<16x128xf32>
    %11 = math.absf %10 : vector<16x128xf32>
    %cst_3 = arith.constant dense<0xFF800000> : vector<16xf32>
    %12 = vector.multi_reduction <maximumf>, %11, %cst_3 [1] : vector<16x128xf32> to vector<16xf32>
    %13 = vector.shape_cast %12 : vector<16xf32> to vector<16x1xf32>
    %cst_4 = arith.constant 9.99999974E-6 : f32
    %14 = vector.broadcast %cst_4 : f32 to vector<16x1xf32>
    %15 = arith.maximumf %13, %14 : vector<16x1xf32>
    %cst_5 = arith.constant 1.270000e+02 : f32
    %16 = vector.broadcast %cst_5 : f32 to vector<16x1xf32>
    %17 = arith.divf %16, %15 : vector<16x1xf32>
    %18 = vector.broadcast %17 : vector<16x1xf32> to vector<16x128xf32>
    %19 = arith.mulf %10, %18 : vector<16x128xf32>
    %20 = math.roundeven %19 : vector<16x128xf32>
    %cst_6 = arith.constant -1.280000e+02 : f32
    %cst_7 = arith.constant 1.270000e+02 : f32
    %21 = vector.broadcast %cst_6 : f32 to vector<16x128xf32>
    %22 = arith.maximumf %21, %20 : vector<16x128xf32>
    %23 = vector.broadcast %cst_7 : f32 to vector<16x128xf32>
    %24 = arith.minimumf %23, %22 : vector<16x128xf32>
    %25 = arith.truncf %24 : vector<16x128xf32> to vector<16x128xbf16>
    %c0_8 = arith.constant 0 : index
    %c0_9 = arith.constant 0 : index
    %26 = vector.load %arg2[%c0_8, %c0_9] : memref<16x128xbf16, #tpu.memory_space<vmem>>, vector<16x128xbf16>
    tpu.vector_store %arg2[%c0_8, %c0_9], %25 {strides = array<i32>} : memref<16x128xbf16, #tpu.memory_space<vmem>>, vector<16x128xbf16>,
    %cst_10 = arith.constant 0.00787401571 : f32
    %27 = vector.broadcast %cst_10 : f32 to vector<16x1xf32>
    %28 = arith.mulf %15, %27 : vector<16x1xf32>
    %c0_11 = arith.constant 0 : index
    %c0_12 = arith.constant 0 : index
    %29 = vector.load %arg3[%c0_11, %c0_12] : memref<16x1xf32, #tpu.memory_space<vmem>>, vector<16x1xf32>
    tpu.vector_store %arg3[%c0_11, %c0_12], %28 {strides = array<i32>} : memref<16x1xf32, #tpu.memory_space<vmem>>, vector<16x1xf32>,
    return
  }
  func.func @transform_0(%arg0: i32) -> (i32, i32) {
    %c0_i32 = arith.constant 0 : i32
    %c0_i32_0 = arith.constant 0 : i32
    return %arg0, %c0_i32 : i32, i32
  }
  func.func @transform_1(%arg0: i32) -> (i32, i32) {
    %c0_i32 = arith.constant 0 : i32
    %c0_i32_0 = arith.constant 0 : i32
    return %arg0, %c0_i32 : i32, i32
  }
  func.func @transform_2(%arg0: i32) -> (i32, i32) {
    %c0_i32 = arith.constant 0 : i32
    %c0_i32_0 = arith.constant 0 : i32
    return %arg0, %c0_i32 : i32, i32
  }
}

module attributes {stable_mosaic.version = 11 : i64} {
  func.func @_swiglu_ff_kernel(%arg0: i32, %arg1: i32, %arg2: i32, %arg3: memref<16x32xbf16, #tpu.memory_space<vmem>>, %arg4: memref<128x32xbf16, #tpu.memory_space<vmem>>, %arg5: memref<128x32xbf16, #tpu.memory_space<vmem>>, %arg6: memref<16x1xf32, #tpu.memory_space<vmem>>, %arg7: memref<16x1xf32, #tpu.memory_space<vmem>>, %arg8: memref<16x128xf32, #tpu.memory_space<vmem>>, %arg9: memref<16x128xf32, #tpu.memory_space<vmem>>, %arg10: memref<16x128xf32, #tpu.memory_space<vmem>>) attributes {dimension_semantics = [#tpu.dimension_semantics<parallel>, #tpu.dimension_semantics<parallel>, #tpu.dimension_semantics<arbitrary>], iteration_bounds = array<i64: 1, 1, 1>, scalar_prefetch = 0 : i64, scratch_operands = 2 : i64, tpu.core_type = #tpu.core_type<tc>, window_params = [{transform_indices = @transform_0, window_bounds = array<i64: 16, 32>}, {transform_indices = @transform_1, window_bounds = array<i64: 128, 32>}, {transform_indices = @transform_2, window_bounds = array<i64: 128, 32>}, {transform_indices = @transform_3, window_bounds = array<i64: 16, 1>}, {transform_indices = @transform_4, window_bounds = array<i64: 16, 1>}, {transform_indices = @transform_5, window_bounds = array<i64: 16, 128>}]} {
    %c0_i32 = arith.constant 0 : i32
    %0 = arith.cmpi eq, %arg2, %c0_i32 : i32
    %1 = arith.extui %0 : i1 to i32
    %c0_i32_0 = arith.constant 0 : i32
    %2 = arith.cmpi ne, %1, %c0_i32_0 : i32
    scf.if %2 {
      %cst_17 = arith.constant 0.000000e+00 : f32
      %17 = vector.broadcast %cst_17 : f32 to vector<16x128xf32>
      %c0_18 = arith.constant 0 : index
      %c0_19 = arith.constant 0 : index
      %18 = vector.load %arg9[%c0_18, %c0_19] : memref<16x128xf32, #tpu.memory_space<vmem>>, vector<16x128xf32>
      tpu.vector_store %arg9[%c0_18, %c0_19], %17 {strides = array<i32>} : memref<16x128xf32, #tpu.memory_space<vmem>>, vector<16x128xf32>,
      %cst_20 = arith.constant 0.000000e+00 : f32
      %19 = vector.broadcast %cst_20 : f32 to vector<16x128xf32>
      %c0_21 = arith.constant 0 : index
      %c0_22 = arith.constant 0 : index
      %20 = vector.load %arg10[%c0_21, %c0_22] : memref<16x128xf32, #tpu.memory_space<vmem>>, vector<16x128xf32>
      tpu.vector_store %arg10[%c0_21, %c0_22], %19 {strides = array<i32>} : memref<16x128xf32, #tpu.memory_space<vmem>>, vector<16x128xf32>,
    } else {
    }
    %c0 = arith.constant 0 : index
    %c0_1 = arith.constant 0 : index
    %3 = vector.load %arg3[%c0, %c0_1] : memref<16x32xbf16, #tpu.memory_space<vmem>>, vector<16x32xbf16>
    %c0_2 = arith.constant 0 : index
    %c0_3 = arith.constant 0 : index
    %4 = vector.load %arg9[%c0_2, %c0_3] : memref<16x128xf32, #tpu.memory_space<vmem>>, vector<16x128xf32>
    %c0_4 = arith.constant 0 : index
    %c0_5 = arith.constant 0 : index
    %5 = vector.load %arg4[%c0_4, %c0_5] : memref<128x32xbf16, #tpu.memory_space<vmem>>, vector<128x32xbf16>
    %cst = arith.constant dense<0.000000e+00> : vector<16x128xf32>
    %6 = tpu.matmul %3, %5, %cst {dimension_numbers = #tpu.dot_dimension_numbers<[1], [1], [0], [0], [0, 0, 1, 0], [], []>} : vector<16x32xbf16>, vector<128x32xbf16>, vector<16x128xf32> -> vector<16x128xf32>
    %7 = arith.addf %4, %6 : vector<16x128xf32>
    %c0_6 = arith.constant 0 : index
    %c0_7 = arith.constant 0 : index
    %8 = vector.load %arg9[%c0_6, %c0_7] : memref<16x128xf32, #tpu.memory_space<vmem>>, vector<16x128xf32>
    tpu.vector_store %arg9[%c0_6, %c0_7], %7 {strides = array<i32>} : memref<16x128xf32, #tpu.memory_space<vmem>>, vector<16x128xf32>,
    %c0_8 = arith.constant 0 : index
    %c0_9 = arith.constant 0 : index
    %9 = vector.load %arg10[%c0_8, %c0_9] : memref<16x128xf32, #tpu.memory_space<vmem>>, vector<16x128xf32>
    %c0_10 = arith.constant 0 : index
    %c0_11 = arith.constant 0 : index
    %10 = vector.load %arg5[%c0_10, %c0_11] : memref<128x32xbf16, #tpu.memory_space<vmem>>, vector<128x32xbf16>
    %cst_12 = arith.constant dense<0.000000e+00> : vector<16x128xf32>
    %11 = tpu.matmul %3, %10, %cst_12 {dimension_numbers = #tpu.dot_dimension_numbers<[1], [1], [0], [0], [0, 0, 1, 0], [], []>} : vector<16x32xbf16>, vector<128x32xbf16>, vector<16x128xf32> -> vector<16x128xf32>
    %12 = arith.addf %9, %11 : vector<16x128xf32>
    %c0_13 = arith.constant 0 : index
    %c0_14 = arith.constant 0 : index
    %13 = vector.load %arg10[%c0_13, %c0_14] : memref<16x128xf32, #tpu.memory_space<vmem>>, vector<16x128xf32>
    tpu.vector_store %arg10[%c0_13, %c0_14], %12 {strides = array<i32>} : memref<16x128xf32, #tpu.memory_space<vmem>>, vector<16x128xf32>,
    %c0_i32_15 = arith.constant 0 : i32
    %14 = arith.cmpi eq, %arg2, %c0_i32_15 : i32
    %15 = arith.extui %14 : i1 to i32
    %c0_i32_16 = arith.constant 0 : i32
    %16 = arith.cmpi ne, %15, %c0_i32_16 : i32
    scf.if %16 {
      %c0_17 = arith.constant 0 : index
      %c0_18 = arith.constant 0 : index
      %17 = vector.load %arg9[%c0_17, %c0_18] : memref<16x128xf32, #tpu.memory_space<vmem>>, vector<16x128xf32>
      %c0_19 = arith.constant 0 : index
      %c0_20 = arith.constant 0 : index
      %18 = vector.load %arg6[%c0_19, %c0_20] : memref<16x1xf32, #tpu.memory_space<vmem>>, vector<16x1xf32>
      %19 = vector.broadcast %18 : vector<16x1xf32> to vector<16x128xf32>
      %20 = arith.mulf %17, %19 : vector<16x128xf32>
      %c0_21 = arith.constant 0 : index
      %c0_22 = arith.constant 0 : index
      %21 = vector.load %arg10[%c0_21, %c0_22] : memref<16x128xf32, #tpu.memory_space<vmem>>, vector<16x128xf32>
      %c0_23 = arith.constant 0 : index
      %c0_24 = arith.constant 0 : index
      %22 = vector.load %arg7[%c0_23, %c0_24] : memref<16x1xf32, #tpu.memory_space<vmem>>, vector<16x1xf32>
      %23 = vector.broadcast %22 : vector<16x1xf32> to vector<16x128xf32>
      %24 = arith.mulf %21, %23 : vector<16x128xf32>
      %25 = arith.negf %20 : vector<16x128xf32>
      %26 = math.exp %25 : vector<16x128xf32>
      %cst_25 = arith.constant 1.000000e+00 : f32
      %27 = vector.broadcast %cst_25 : f32 to vector<16x128xf32>
      %28 = arith.addf %27, %26 : vector<16x128xf32>
      %29 = arith.divf %27, %28 : vector<16x128xf32>
      %30 = arith.mulf %20, %29 : vector<16x128xf32>
      %31 = arith.mulf %30, %24 : vector<16x128xf32>
      %c0_26 = arith.constant 0 : index
      %c0_27 = arith.constant 0 : index
      %32 = vector.load %arg8[%c0_26, %c0_27] : memref<16x128xf32, #tpu.memory_space<vmem>>, vector<16x128xf32>
      tpu.vector_store %arg8[%c0_26, %c0_27], %31 {strides = array<i32>} : memref<16x128xf32, #tpu.memory_space<vmem>>, vector<16x128xf32>,
    } else {
    }
    return
  }
  func.func @transform_0(%arg0: i32, %arg1: i32, %arg2: i32) -> (i32, i32) {
    %c0_i32 = arith.constant 0 : i32
    return %arg0, %arg2 : i32, i32
  }
  func.func @transform_1(%arg0: i32, %arg1: i32, %arg2: i32) -> (i32, i32) {
    %c0_i32 = arith.constant 0 : i32
    return %arg1, %arg2 : i32, i32
  }
  func.func @transform_2(%arg0: i32, %arg1: i32, %arg2: i32) -> (i32, i32) {
    %c0_i32 = arith.constant 0 : i32
    return %arg1, %arg2 : i32, i32
  }
  func.func @transform_3(%arg0: i32, %arg1: i32, %arg2: i32) -> (i32, i32) {
    %c0_i32 = arith.constant 0 : i32
    %c0_i32_0 = arith.constant 0 : i32
    return %arg0, %c0_i32 : i32, i32
  }
  func.func @transform_4(%arg0: i32, %arg1: i32, %arg2: i32) -> (i32, i32) {
    %c0_i32 = arith.constant 0 : i32
    %c0_i32_0 = arith.constant 0 : i32
    return %arg0, %c0_i32 : i32, i32
  }
  func.func @transform_5(%arg0: i32, %arg1: i32, %arg2: i32) -> (i32, i32) {
    %c0_i32 = arith.constant 0 : i32
    return %arg0, %arg1 : i32, i32
  }
}

module attributes {stable_mosaic.version = 11 : i64} {
  func.func @_bitlinear_matmul_kernel(%arg0: i32, %arg1: i32, %arg2: i32, %arg3: memref<16x128xbf16, #tpu.memory_space<vmem>>, %arg4: memref<32x128xbf16, #tpu.memory_space<vmem>>, %arg5: memref<16x1xf32, #tpu.memory_space<vmem>>, %arg6: memref<16x32xf32, #tpu.memory_space<vmem>>, %arg7: memref<16x32xf32, #tpu.memory_space<vmem>>) attributes {dimension_semantics = [#tpu.dimension_semantics<parallel>, #tpu.dimension_semantics<parallel>, #tpu.dimension_semantics<arbitrary>], iteration_bounds = array<i64: 1, 1, 1>, scalar_prefetch = 0 : i64, scratch_operands = 1 : i64, tpu.core_type = #tpu.core_type<tc>, window_params = [{transform_indices = @transform_0, window_bounds = array<i64: 16, 128>}, {transform_indices = @transform_1, window_bounds = array<i64: 32, 128>}, {transform_indices = @transform_2, window_bounds = array<i64: 16, 1>}, {transform_indices = @transform_3, window_bounds = array<i64: 16, 32>}]} {
    %c0_i32 = arith.constant 0 : i32
    %0 = arith.cmpi eq, %arg2, %c0_i32 : i32
    %1 = arith.extui %0 : i1 to i32
    %c0_i32_0 = arith.constant 0 : i32
    %2 = arith.cmpi ne, %1, %c0_i32_0 : i32
    scf.if %2 {
      %cst_10 = arith.constant 0.000000e+00 : f32
      %12 = vector.broadcast %cst_10 : f32 to vector<16x32xf32>
      %c0_11 = arith.constant 0 : index
      %c0_12 = arith.constant 0 : index
      %13 = vector.load %arg7[%c0_11, %c0_12] : memref<16x32xf32, #tpu.memory_space<vmem>>, vector<16x32xf32>
      tpu.vector_store %arg7[%c0_11, %c0_12], %12 {strides = array<i32>} : memref<16x32xf32, #tpu.memory_space<vmem>>, vector<16x32xf32>,
    } else {
    }
    %c0 = arith.constant 0 : index
    %c0_1 = arith.constant 0 : index
    %3 = vector.load %arg7[%c0, %c0_1] : memref<16x32xf32, #tpu.memory_space<vmem>>, vector<16x32xf32>
    %c0_2 = arith.constant 0 : index
    %c0_3 = arith.constant 0 : index
    %4 = vector.load %arg3[%c0_2, %c0_3] : memref<16x128xbf16, #tpu.memory_space<vmem>>, vector<16x128xbf16>
    %c0_4 = arith.constant 0 : index
    %c0_5 = arith.constant 0 : index
    %5 = vector.load %arg4[%c0_4, %c0_5] : memref<32x128xbf16, #tpu.memory_space<vmem>>, vector<32x128xbf16>
    %cst = arith.constant dense<0.000000e+00> : vector<16x32xf32>
    %6 = tpu.matmul %4, %5, %cst {dimension_numbers = #tpu.dot_dimension_numbers<[1], [1], [0], [0], [0, 0, 1, 0], [], []>} : vector<16x128xbf16>, vector<32x128xbf16>, vector<16x32xf32> -> vector<16x32xf32>
    %7 = arith.addf %3, %6 : vector<16x32xf32>
    %c0_6 = arith.constant 0 : index
    %c0_7 = arith.constant 0 : index
    %8 = vector.load %arg7[%c0_6, %c0_7] : memref<16x32xf32, #tpu.memory_space<vmem>>, vector<16x32xf32>
    tpu.vector_store %arg7[%c0_6, %c0_7], %7 {strides = array<i32>} : memref<16x32xf32, #tpu.memory_space<vmem>>, vector<16x32xf32>,
    %c0_i32_8 = arith.constant 0 : i32
    %9 = arith.cmpi eq, %arg2, %c0_i32_8 : i32
    %10 = arith.extui %9 : i1 to i32
    %c0_i32_9 = arith.constant 0 : i32
    %11 = arith.cmpi ne, %10, %c0_i32_9 : i32
    scf.if %11 {
      %c0_10 = arith.constant 0 : index
      %c0_11 = arith.constant 0 : index
      %12 = vector.load %arg7[%c0_10, %c0_11] : memref<16x32xf32, #tpu.memory_space<vmem>>, vector<16x32xf32>
      %c0_12 = arith.constant 0 : index
      %c0_13 = arith.constant 0 : index
      %13 = vector.load %arg5[%c0_12, %c0_13] : memref<16x1xf32, #tpu.memory_space<vmem>>, vector<16x1xf32>
      %14 = vector.broadcast %13 : vector<16x1xf32> to vector<16x32xf32>
      %15 = arith.mulf %12, %14 : vector<16x32xf32>
      %c0_14 = arith.constant 0 : index
      %c0_15 = arith.constant 0 : index
      %16 = vector.load %arg6[%c0_14, %c0_15] : memref<16x32xf32, #tpu.memory_space<vmem>>, vector<16x32xf32>
      tpu.vector_store %arg6[%c0_14, %c0_15], %15 {strides = array<i32>} : memref<16x32xf32, #tpu.memory_space<vmem>>, vector<16x32xf32>,
    } else {
    }
    return
  }
  func.func @transform_0(%arg0: i32, %arg1: i32, %arg2: i32) -> (i32, i32) {
    %c0_i32 = arith.constant 0 : i32
    return %arg0, %arg2 : i32, i32
  }
  func.func @transform_1(%arg0: i32, %arg1: i32, %arg2: i32) -> (i32, i32) {
    %c0_i32 = arith.constant 0 : i32
    return %arg1, %arg2 : i32, i32
  }
  func.func @transform_2(%arg0: i32, %arg1: i32, %arg2: i32) -> (i32, i32) {
    %c0_i32 = arith.constant 0 : i32
    %c0_i32_0 = arith.constant 0 : i32
    return %arg0, %c0_i32 : i32, i32
  }
  func.func @transform_3(%arg0: i32, %arg1: i32, %arg2: i32) -> (i32, i32) {
    %c0_i32 = arith.constant 0 : i32
    return %arg0, %arg1 : i32, i32
  }
}

module attributes {stable_mosaic.version = 11 : i64} {
  func.func @_norm_vocab_kernel(%arg0: i32, %arg1: i32, %arg2: memref<16x32xf32, #tpu.memory_space<vmem>>, %arg3: memref<1x32xf32, #tpu.memory_space<vmem>>, %arg4: memref<64x32xf32, #tpu.memory_space<vmem>>, %arg5: memref<16x64xf32, #tpu.memory_space<vmem>>) attributes {dimension_semantics = [#tpu.dimension_semantics<parallel>, #tpu.dimension_semantics<parallel>], iteration_bounds = array<i64: 1, 1>, scalar_prefetch = 0 : i64, scratch_operands = 0 : i64, tpu.core_type = #tpu.core_type<tc>, window_params = [{transform_indices = @transform_0, window_bounds = array<i64: 16, 32>}, {pipeline_mode = #tpu.pipeline_mode<synchronous>, transform_indices = @transform_1, window_bounds = array<i64: 1, 32>}, {transform_indices = @transform_2, window_bounds = array<i64: 64, 32>}, {transform_indices = @transform_3, window_bounds = array<i64: 16, 64>}]} {
    %c0 = arith.constant 0 : index
    %c0_0 = arith.constant 0 : index
    %0 = vector.load %arg2[%c0, %c0_0] : memref<16x32xf32, #tpu.memory_space<vmem>>, vector<16x32xf32>
    %c0_1 = arith.constant 0 : index
    %c0_2 = arith.constant 0 : index
    %1 = vector.load %arg3[%c0_1, %c0_2] : memref<1x32xf32, #tpu.memory_space<vmem>>, vector<1x32xf32>
    %2 = arith.mulf %0, %0 : vector<16x32xf32>
    %cst = arith.constant dense<0.000000e+00> : vector<16xf32>
    %3 = vector.multi_reduction <add>, %2, %cst [1] : vector<16x32xf32> to vector<16xf32>
    %4 = vector.shape_cast %3 : vector<16xf32> to vector<16x1xf32>
    %cst_3 = arith.constant 3.200000e+01 : f32
    %5 = vector.broadcast %cst_3 : f32 to vector<16x1xf32>
    %6 = arith.divf %4, %5 : vector<16x1xf32>
    %cst_4 = arith.constant 9.99999997E-7 : f32
    %7 = vector.broadcast %cst_4 : f32 to vector<16x1xf32>
    %8 = arith.addf %6, %7 : vector<16x1xf32>
    %9 = math.rsqrt %8 : vector<16x1xf32>
    %10 = vector.broadcast %9 : vector<16x1xf32> to vector<16x32xf32>
    %11 = arith.mulf %0, %10 : vector<16x32xf32>
    %12 = vector.broadcast %1 : vector<1x32xf32> to vector<16x32xf32>
    %13 = arith.mulf %11, %12 : vector<16x32xf32>
    %c0_5 = arith.constant 0 : index
    %c0_6 = arith.constant 0 : index
    %14 = vector.load %arg4[%c0_5, %c0_6] : memref<64x32xf32, #tpu.memory_space<vmem>>, vector<64x32xf32>
    %cst_7 = arith.constant dense<0.000000e+00> : vector<16x64xf32>
    %15 = tpu.matmul %13, %14, %cst_7 {dimension_numbers = #tpu.dot_dimension_numbers<[1], [1], [0], [0], [0, 0, 1, 0], [], []>} : vector<16x32xf32>, vector<64x32xf32>, vector<16x64xf32> -> vector<16x64xf32>
    %c0_8 = arith.constant 0 : index
    %c0_9 = arith.constant 0 : index
    %16 = vector.load %arg5[%c0_8, %c0_9] : memref<16x64xf32, #tpu.memory_space<vmem>>, vector<16x64xf32>
    tpu.vector_store %arg5[%c0_8, %c0_9], %15 {strides = array<i32>} : memref<16x64xf32, #tpu.memory_space<vmem>>, vector<16x64xf32>,
    return
  }
  func.func @transform_0(%arg0: i32, %arg1: i32) -> (i32, i32) {
    %c0_i32 = arith.constant 0 : i32
    %c0_i32_0 = arith.constant 0 : i32
    return %arg0, %c0_i32 : i32, i32
  }
  func.func @transform_1(%arg0: i32, %arg1: i32) -> (i32, i32) {
    %c0_i32 = arith.constant 0 : i32
    %c0_i32_0 = arith.constant 0 : i32
    %c0_i32_1 = arith.constant 0 : i32
    return %c0_i32, %c0_i32_0 : i32, i32
  }
  func.func @transform_2(%arg0: i32, %arg1: i32) -> (i32, i32) {
    %c0_i32 = arith.constant 0 : i32
    %c0_i32_0 = arith.constant 0 : i32
    return %arg1, %c0_i32 : i32, i32
  }
  func.func @transform_3(%arg0: i32, %arg1: i32) -> (i32, i32) {
    %c0_i32 = arith.constant 0 : i32
    return %arg0, %arg1 : i32, i32
  }
}

</mosaic_0001>

<bundles_post_ra>
// kernel: transformer_forward.25
= control target key start
LH: loop header
LB: loop body
LE: loop exit
PB: predicated region body
PF: predicated region fallthrough
CT: control target
= control target key end

     0   :  { %vm19_vm0 = vcmask 261120   ;;  %v147_v0 = vmov 0.0   ;;  %vm148_vm1 = vmmov 0   ;;  %v149_v2 = vmov 0   ;;  %s200_s1 = inlined_call_operand.vmem [shape: bf16[32,32], index: 1, kind: input, shape index: {}]   ;;  %s201_s2 = inlined_call_operand.vmem [shape: f32[16,1], index: 2, kind: input, shape index: {}]   ;;  %s202_s0 = inlined_call_operand.vmem [shape: bf16[16,32], index: 0, kind: input, shape index: {}]   ;;  %s203_s3 = inlined_call_operand.vmem [shape: f32[16,32], index: 3, kind: output, shape index: {}]  }
   0x1   :  { %132 = vmatprep.subr.bf16.mxu0 %v147_v0  ;;  %v144_v1 = vld [vmem:[%s200_s1] sm:$0xff]   ;;  %20 = vst.msk [vmem:[#allocation2] sm:$0xff] %vm19_vm0, %v147_v0  ;;  %21 = vst.msk [vmem:[#allocation2 + $0x8] sm:$0xff] %vm19_vm0, %v147_v0  ;;  %136 = vmatprep.mubr.msk.bf16.mxu0 %vm148_vm1, %v147_v0  ;;  %v145_v5 = vld [vmem:[%s200_s1 + $0x8] sm:$0xff]  }
   0x2   :  { %143 = vset.pattern.permute.xlu0 %v149_v2  ;;  %v50_v3 = vsel %vm19_vm0, %v144_v1, 0  ;;  %v105_v4 = vld [vmem:[%s201_s2] sm:$0xff]  ;;  %v106_v6 = vld [vmem:[%s201_s2 + $0x8] sm:$0xff]  ;;  %v53_v7 = vsel %vm19_vm0, %v145_v5, 0 }
   0x3   :  { %133 = vmatpush3.bf16.xpose.msra.mxu0 %v50_v3  ;;  %109 = vperm.xlu0 %143, %v105_v4   ;;  %v146_v8 = vld [vmem:[%s202_s0] sm:$0xff]  }
   0x4   :  { %134 = vmatprep.subr.bf16.mxu0 %v147_v0 }
   0x7   :  { %114 = vperm.xlu0 %143, %v106_v6  }
   0x8   :  { %v22_v9 = vld [vmem:[#allocation2] sm:$0xff]  ;;  %v23_v11 = vld [vmem:[#allocation2 + $0x8] sm:$0xff] }
   0xb   :  { %135 = vmatpush3.bf16.xpose.msra.mxu0 %v53_v7 }
  0x12   :  { %137 = vmatmul.mubr.msk.bf16.vlgmr.msra.gmra.mrb[0].mxu0 %vm19_vm0, %v146_v8 }
  0x82   :  { %v110_v17 = vpop.permute.xlu0 %109 }
  0x86   :  { %v115_v20 = vpop.permute.xlu0 %114 }
  0xe5   :  { %v89_v10 = vpop.f32.mrb[0].mxu0 }
  0xe6   :  { %v96_v12 = vadd.f32 %v89_v10, %v22_v9  ;;  %v138_v13 = vpop.f32.mrb[1].mxu0 }
  0xe7   :  { %v92_v14 = vpop.f32.mrb[2].mxu0 }
  0xe8   :  { %98 = vst.msk [vmem:[#allocation2] sm:$0xff] %vm19_vm0, %v96_v12  ;;  %v97_v15 = vadd.f32 %v92_v14, %v23_v11  ;;  %v139_v16 = vpop.f32.mrb[3].mxu0 }
  0xea   :  { %99 = vst.msk [vmem:[#allocation2 + $0x8] sm:$0xff] %vm19_vm0, %v97_v15 }
  0xef   :  { %v103_v18 = vld [vmem:[#allocation2] sm:$0xff] }
  0xf0   :  { %v117_v19 = vmul.f32 %v110_v17, %v103_v18 }
  0xf1   :  { %v104_v21 = vld [vmem:[#allocation2 + $0x8] sm:$0xff] }
  0xf2   :  { %119 = vst.msk [vmem:[%s203_s3] sm:$0xff] %vm19_vm0, %v117_v19  ;;  %v118_v22 = vmul.f32 %v115_v20, %v104_v21 }
  0xf4   :  { %120 = vst.msk [vmem:[%s203_s3 + $0x8] sm:$0xff] %vm19_vm0, %v118_v22 }

// kernel: transformer_forward.23
= control target key start
LH: loop header
LB: loop body
LE: loop exit
PB: predicated region body
PF: predicated region fallthrough
CT: control target
= control target key end

     0   :  { %vm14_vm0 = vcmask 261120   ;;  %vm65_vm1 = vcmask 7168   ;;  %vm60_vm2 = vcmask 257024   ;;  %s127_s0 = inlined_call_operand.vmem [shape: f32[16,32], index: 0, kind: input, shape index: {}]   ;;  %s128_s2 = inlined_call_operand.vmem [shape: f32[16,1], index: 2, kind: output, shape index: {1}]   ;;  %s129_s1 = inlined_call_operand.vmem [shape: bf16[16,32], index: 1, kind: output, shape index: {0}]  }
   0x1   :  { %v10_v0 = vld [vmem:[%s127_s0] sm:$0xff]  ;;  %v11_v1 = vld [vmem:[%s127_s0 + $0x8] sm:$0xff] }
   0x2   :  { %v12_v2 = vmul.f32 %v10_v0, %v10_v0  ;;  %v13_v3 = vmul.f32 %v11_v1, %v11_v1 }
   0x4   :  { %v15_v4 = vsel %vm14_vm0, %v12_v2, 0.0  ;;  %v18_v5 = vsel %vm14_vm0, %v13_v3, 0.0 }
   0x5   :  { %16 = vadd.xlane.f32.xlu0 %v15_v4 }
   0x9   :  { %19 = vadd.xlane.f32.xlu0 %v18_v5 }
  0x92   :  { %v17_v6 = vpop.xlane.xlu0 %16 }
  0x93   :  { %v22_v7 = vmul.f32 0.03125, %v17_v6 }
  0x95   :  { %v24_v8 = vadd.f32 1e-05, %v22_v7 }
  0x96   :  { %v20_v9 = vpop.xlane.xlu0 %19 }
  0x97   :  { %82 = vrsqrt.f32 %v24_v8  ;;  %v23_v10 = vmul.f32 0.03125, %v20_v9 }
  0x99   :  { %v25_v11 = vadd.f32 1e-05, %v23_v10 }
  0x9b   :  { %84 = vrsqrt.f32 %v25_v11 }
  0xa1   :  { %v83_v12 = vpop.eup %82 }
  0xa2   :  { %v28_v13 = vmul.f32 %v83_v12, %v10_v0 }
  0xa4   :  { %v30_v14 = vand.u32 2147483647, %v28_v13 }
  0xa5   :  { %v85_v15 = vpop.eup %84 }
  0xa6   :  { %v32_v16 = vsel %vm14_vm0, %v30_v14, -inf  ;;  %v29_v17 = vmul.f32 %v85_v15, %v11_v1 }
  0xa7   :  { %33 = vmax.xlane.f32.xlu1 %v32_v16 }
  0xa8   :  { %v31_v18 = vand.u32 2147483647, %v29_v17 }
  0xaa   :  { %v35_v19 = vsel %vm14_vm0, %v31_v18, -inf }
  0xab   :  { %36 = vmax.xlane.f32.xlu1 %v35_v19 }
 0x134   :  { %v34_v20 = vpop.xlane.xlu1 %33 }
 0x135   :  { %v38_v21 = vmax.f32 %v34_v20, 1e-05 }
 0x137   :  { %86 = vrcp.f32 %v38_v21  ;;  %v63_v22 = vmul.f32 0.007874016, %v38_v21 }
 0x138   :  { %v37_v23 = vpop.xlane.xlu1 %36 }
 0x139   :  { %66 = vst.msk [vmem:[%s128_s2] sm:$0xff] %vm65_vm1, %v63_v22  ;;  %v39_v24 = vmax.f32 %v37_v23, 1e-05 }
 0x13b   :  { %88 = vrcp.f32 %v39_v24  ;;  %v64_v25 = vmul.f32 0.007874016, %v39_v24 }
 0x13d   :  { %67 = vst.msk [vmem:[%s128_s2 + $0x8] sm:$0xff] %vm65_vm1, %v64_v25 }
 0x141   :  { %v87_v26 = vpop.eup %86 }
 0x142   :  { %v41_v27 = vmul.f32 127.0, %v87_v26 }
 0x144   :  { %v44_v28 = vmul.f32 %v41_v27, %v28_v13 }
 0x145   :  { %v89_v29 = vpop.eup %88 }
 0x146   :  { %v80_v30 = vround.rtne.f32 %v44_v28  ;;  %v43_v31 = vmul.f32 127.0, %v89_v29 }
 0x148   :  { %v48_v32 = vmax.f32 %v80_v30, -128.0  ;;  %v45_v33 = vmul.f32 %v43_v31, %v29_v17 }
 0x14a   :  { %v50_v34 = vmin.f32 %v48_v32, 127.0  ;;  %v81_v35 = vround.rtne.f32 %v45_v33 }
 0x14c   :  { %v78_v36 = vpack.c.bf16 %v50_v34, %v50_v34  ;;  %v49_v37 = vmax.f32 %v81_v35, -128.0 }
 0x14e   :  { %61 = vst.msk [vmem:[%s129_s1] sm:$0xf] %vm60_vm2, %v78_v36  ;;  %v51_v38 = vmin.f32 %v49_v37, 127.0 }
 0x150   :  { %v79_v39 = vpack.c.bf16 %v51_v38, %v51_v38 }
 0x152   :  { %62 = vst.msk [vmem:[%s129_s1 + $0x4] sm:$0xf] %vm60_vm2, %v79_v39 }

// kernel: transformer_forward.32
= control target key start
LH: loop header
LB: loop body
LE: loop exit
PB: predicated region body
PF: predicated region fallthrough
CT: control target
= control target key end

     0   :  { %vm59_vm0 = vcmask 7168   ;;  %s119_s0 = inlined_call_operand.vmem [shape: f32[16,128], index: 0, kind: input, shape index: {}]   ;;  %s120_s2 = inlined_call_operand.vmem [shape: f32[16,1], index: 2, kind: output, shape index: {1}]   ;;  %s121_s1 = inlined_call_operand.vmem [shape: bf16[16,128], index: 1, kind: output, shape index: {0}]  }
   0x1   :  { %v10_v0 = vld [vmem:[%s119_s0] sm:$0xff]  ;;  %v11_v1 = vld [vmem:[%s119_s0 + $0x8] sm:$0xff] }
   0x2   :  { %v12_v2 = vmul.f32 %v10_v0, %v10_v0  ;;  %v13_v3 = vmul.f32 %v11_v1, %v11_v1 }
   0x4   :  { %14 = vadd.xlane.f32.xlu0 %v12_v2 }
   0x8   :  { %16 = vadd.xlane.f32.xlu0 %v13_v3 }
  0x91   :  { %v15_v4 = vpop.xlane.xlu0 %14 }
  0x92   :  { %v19_v5 = vmul.f32 0.0078125, %v15_v4 }
  0x94   :  { %v21_v6 = vadd.f32 1e-05, %v19_v5 }
  0x95   :  { %v17_v7 = vpop.xlane.xlu0 %16 }
  0x96   :  { %81 = vrsqrt.f32 %v21_v6  ;;  %v20_v8 = vmul.f32 0.0078125, %v17_v7 }
  0x98   :  { %v22_v9 = vadd.f32 1e-05, %v20_v8 }
  0x9a   :  { %83 = vrsqrt.f32 %v22_v9 }
  0xa0   :  { %v82_v10 = vpop.eup %81 }
  0xa1   :  { %v25_v11 = vmul.f32 %v82_v10, %v10_v0 }
  0xa3   :  { %v27_v12 = vand.u32 2147483647, %v25_v11 }
  0xa4   :  { %v84_v13 = vpop.eup %83 }
  0xa5   :  { %29 = vmax.xlane.f32.xlu1 %v27_v12  ;;  %v26_v14 = vmul.f32 %v84_v13, %v11_v1 }
  0xa7   :  { %v28_v15 = vand.u32 2147483647, %v26_v14 }
  0xa9   :  { %31 = vmax.xlane.f32.xlu1 %v28_v15 }
 0x132   :  { %v30_v16 = vpop.xlane.xlu1 %29 }
 0x133   :  { %v33_v17 = vmax.f32 %v30_v16, 1e-05 }
 0x135   :  { %85 = vrcp.f32 %v33_v17  ;;  %v57_v18 = vmul.f32 0.007874016, %v33_v17 }
 0x136   :  { %v32_v19 = vpop.xlane.xlu1 %31 }
 0x137   :  { %60 = vst.msk [vmem:[%s120_s2] sm:$0xff] %vm59_vm0, %v57_v18  ;;  %v34_v20 = vmax.f32 %v32_v19, 1e-05 }
 0x139   :  { %87 = vrcp.f32 %v34_v20  ;;  %v58_v21 = vmul.f32 0.007874016, %v34_v20 }
 0x13b   :  { %61 = vst.msk [vmem:[%s120_s2 + $0x8] sm:$0xff] %vm59_vm0, %v58_v21 }
 0x13f   :  { %v86_v22 = vpop.eup %85 }
 0x140   :  { %v36_v23 = vmul.f32 127.0, %v86_v22 }
 0x142   :  { %v39_v24 = vmul.f32 %v36_v23, %v25_v11 }
 0x143   :  { %v88_v25 = vpop.eup %87 }
 0x144   :  { %v79_v26 = vround.rtne.f32 %v39_v24  ;;  %v38_v27 = vmul.f32 127.0, %v88_v25 }
 0x146   :  { %v40_v28 = vmul.f32 %v38_v27, %v26_v14  ;;  %v43_v29 = vmax.f32 %v79_v26, -128.0 }
 0x148   :  { %v80_v30 = vround.rtne.f32 %v40_v28  ;;  %v45_v32 = vmin.f32 %v43_v29, 127.0 }
 0x14a   :  { %v44_v31 = vmax.f32 %v80_v30, -128.0 }
 0x14c   :  { %v46_v33 = vmin.f32 %v44_v31, 127.0 }
 0x14e   :  { %v77_v34 = vpack.c.bf16 %v46_v33, %v45_v32 }
 0x150   :  { %78 = vst [vmem:[%s121_s1] sm:$0xff] %v77_v34  }

// kernel: transformer_forward.27
= control target key start
LH: loop header
LB: loop body
LE: loop exit
PB: predicated region body
PF: predicated region fallthrough
CT: control target
= control target key end

     0   :  { %s709_s12 = smov 0   ;;  %s711_s13 = smov 0   ;;  %s766_s0 = inlined_call_operand.vmem [shape: f32[8,8,8], index: 0, kind: input, shape index: {}]   ;;  %s767_s1 = inlined_call_operand.vmem [shape: f32[8,8,8], index: 1, kind: input, shape index: {}]   ;;  %s768_s2 = inlined_call_operand.vmem [shape: f32[8,8,8], index: 2, kind: input, shape index: {}]   ;;  %s769_s3 = inlined_call_operand.vmem [shape: f32[8,8,8], index: 3, kind: output, shape index: {}]  }
   0x1   :  { %s713_s14 = smov 0  }
   0x2 LB: > { %s32_s15 = sadd.s32 1, %s679_s13  ;;  %p601_p0 = scmp.ge.s32.totalorder %s683_s14, 1  ;;  %s683_s14 = sphi %s713_s14, %s13_s14   ;;  %s679_s13 = sphi %s711_s13, %s771_s13   ;;  %s675_s12 = sphi %s709_s12, %s770_s12  }
   0x3   : > { %p34_p1 = scmp.ge.s32.totalorder %s32_s15, 8  ;;  %p190_p2 = scmp.lt.s32.totalorder %s683_s14, 9 }
   0x5   : > { %s773_s15 = smov (%p34_p1, %s32_s15), 0  ;;  %p191_p3 = pnand %p601_p0, %p190_p2 }
   0x6   : > { %p232_p4 = scmp.lt.s32.totalorder (!%p191_p3), %s675_s12, 7  ;;  %vm267_vm0 = vcmask (!%p191_p3), 64512   ;;  %v685_v0 = vmov (!%p191_p3), 0.0   ;;  %vm686_vm1 = vmmov (!%p191_p3), 0   ;;  %vm264_vm2 = vcmask (!%p191_p3), 7168  }
   0x7   : > { %194 = sbr.rel (%p191_p3) target bundleno = 819 (0x333), region = 32  ;;  %615 = vmatprep.subr.mxu0 (!%p191_p3), %v685_v0  ;;  %268 = vst.msk [vmem:[#allocation4] sm:$0xff] (!%p191_p3), %vm267_vm0, %v685_v0  ;;  %617 = vmatprep.mubr.msk.f32.mxu0 (!%p191_p3), %vm686_vm1, %v685_v0  ;;  %v687_v3 = vmov (!%p191_p3), -inf   ;;  %v359_v4 = vlaneseq (!%p191_p3)  ;;  %v688_v12 = vmov (!%p191_p3), 0  }
   0x8   : > { %620 = vmatprep.subr.mxu1 (!%p191_p3), %v685_v0  ;;  %622 = vmatprep.mubr.msk.f32.mxu1 (!%p191_p3), %vm686_vm1, %v685_v0  ;;  %265 = vst.msk [vmem:[#allocation2] sm:$0xff] (!%p191_p3), %vm264_vm2, %v687_v3  ;;  %266 = vst.msk [vmem:[#allocation3] sm:$0xff] (!%p191_p3), %vm264_vm2, %v685_v0 }
   0x9   : > { %v360_v5 = vshrl.u32 (!%p191_p3), %v359_v4, 7  ;;  %v364_v6 = vand.u32 (!%p191_p3), 127, %v359_v4  ;;  %653 = vset.pattern.permute.xlu0 (!%p191_p3), %v688_v12  ;;  %654 = vset.pattern.permute.xlu1 (!%p191_p3), %v688_v12 }
   0xb   : > { %vm367_vm3 = vcmp.le.s32.totalorder (!%p191_p3), %v364_v6, %v360_v5 }
   0xe   : > { %s775_s12 = smov (!%p232_p4, %s675_s12), 7  ;;  %v393_v31 = vld [vmem:[#allocation4] sm:$0xff] }
   0xf   : > { %s728_s16 = sshll.u32 %s775_s12, 3  ;;  %v369_v13 = vld [vmem:[#allocation2] sm:$0xff]  ;;  %v385_v25 = vld [vmem:[#allocation3] sm:$0xff] }
  0x10   : > { %s245_s19 = scalar_lea.vmem %s767_s1, %s728_s16  ;;  %s238_s22 = scalar_lea.vmem %s766_s0, %s728_s16 }
  0x11   : > { %v278_v1 = vld [vmem:[%s245_s19] sm:$0xff]  ;;  %s252_s25 = scalar_lea.vmem %s768_s2, %s728_s16  ;;  %s259_s28 = scalar_lea.vmem %s769_s3, %s728_s16 }
  0x12   : > { %616 = vmatpush3.xpose.msk.msra.mxu0 %vm267_vm0, %v278_v1  ;;  %v277_v2 = vld [vmem:[%s238_s22] sm:$0xff] }
  0x13   : > { %v279_v17 = vld [vmem:[%s252_s25] sm:$0xff] }
  0x14   : > { %621 = vmatpush3.msra.mxu1 %v279_v17 }
  0x15   : > { %618 = vmatmul.mubr.msk.f32.vlgmr.msra.gmra.mrb[0].mxu0 %vm267_vm0, %v277_v2 }
  0xe8   : > { %v353_v7 = vpop.f32.mrb[0].mxu0 }
  0xe9   : > { %v357_v8 = vmul.f32 0.35355338, %v353_v7  ;;  %v619_v9 = vpop.f32.mrb[1].mxu0 }
  0xeb   : > { %v368_v10 = vsel %vm367_vm3, %v357_v8, -1e+30 }
  0xec   : > { %v370_v11 = vsel %vm267_vm0, %v368_v10, -inf }
  0xed   : > { %371 = vmax.xlane.f32.xlu0 %v370_v11 }
 0x17a   : > { %v372_v14 = vpop.xlane.xlu0 %371 }
 0x17b   : > { %v373_v15 = vmax.f32 %v369_v13, %v372_v14 }
 0x17d   : > { %v374_v16 = vsub.f32 %v369_v13, %v373_v15  ;;  %475 = vst.msk [vmem:[#allocation2] sm:$0xff] %vm264_vm2, %v373_v15  ;;  %379 = vperm.xlu0 %653, %v373_v15  }
 0x17f   : > { %v375_v23 = vmul.f32 1.442695, %v374_v16 }
 0x1fc   : > { %v380_v18 = vpop.permute.xlu0 %379 }
 0x1fd   : > { %v382_v19 = vsub.f32 %v368_v10, %v380_v18 }
 0x1ff   : > { %v383_v20 = vmul.f32 1.442695, %v382_v19 }
 0x201   : > { %655 = vpow2.f32 %v383_v20 }
 0x202   : > { %657 = vpow2.f32 %v375_v23 }
 0x20b   : > { %v656_v21 = vpop.eup %655 }
 0x20c   : > { %623 = vmatmul.mubr.msk.f32.vlgmr.msra.gmra.mrb[0].mxu1 %vm267_vm0, %v656_v21  ;;  %v387_v22 = vsel %vm267_vm0, %v656_v21, 0.0  ;;  %v658_v24 = vpop.eup %657 }
 0x20d   : > { %388 = vadd.xlane.f32.xlu1 %v387_v22  ;;  %v386_v26 = vmul.f32 %v658_v24, %v385_v25 }
 0x21e   : > { %396 = vperm.xlu1 %654, %v658_v24  }
 0x29a   : > { %v389_v27 = vpop.xlane.xlu1 %388 }
 0x29b   : > { %v390_v28 = vadd.f32 %v389_v27, %v386_v26 }
 0x29d   : > { %392 = vst.msk [vmem:[#allocation3] sm:$0xff] %vm264_vm2, %v390_v28 }
 0x29e   : > { %v397_v32 = vpop.permute.xlu1 %396 }
 0x29f   : > { %v399_v33 = vmul.f32 %v397_v32, %v393_v31 }
 0x2a4   : > { %v479_v29 = vld [vmem:[#allocation3] sm:$0xff] }
 0x2a5   : > { %659 = vrcp.f32 %v479_v29 }
 0x2af   : > { %v660_v30 = vpop.eup %659 }
 0x2b0   : > { %484 = vperm.xlu1 %654, %v660_v30  }
 0x2df   : > { %v469_v34 = vpop.f32.mrb[0].mxu1 }
 0x2e0   : > { %v473_v35 = vadd.f32 %v469_v34, %v399_v33  ;;  %v624_v36 = vpop.f32.mrb[1].mxu1 }
 0x2e2   : > { %474 = vst.msk [vmem:[#allocation4] sm:$0xff] %vm267_vm0, %v473_v35 }
 0x2e9   : > { %v481_v37 = vld [vmem:[#allocation4] sm:$0xff] }
 0x32f   : > { %v485_v38 = vpop.permute.xlu1 %484 }
 0x330   : > { %v487_v39 = vmul.f32 %v485_v38, %v481_v37 }
 0x332   : > { %489 = vst.msk [vmem:[%s259_s28] sm:$0xff] %vm267_vm0, %v487_v39 }
 0x333 PF: > { %s13_s14 = sadd.s32 1, %s683_s14   ;;  %s770_s12 = smov %s679_s13 }
 0x334   : > { %p10_p5 = scmp.ge.s32.totalorder %s13_s14, 10   ;;  %s771_s13 = smov %s773_s15 }
 0x336   :  { %12 = sbr.rel (!%p10_p5) target bundleno = 2 (0x2), region = 80 }

// kernel: transformer_forward.31
= control target key start
LH: loop header
LB: loop body
LE: loop exit
PB: predicated region body
PF: predicated region fallthrough
CT: control target
= control target key end

     0   :  { %vm94_vm0 = vcmask 261120   ;;  %v460_v0 = vmov 0.0   ;;  %vm461_vm1 = vmmov 0   ;;  %v462_v3 = vmov 0   ;;  %s598_s1 = inlined_call_operand.vmem [shape: bf16[128,32], index: 1, kind: input, shape index: {}]   ;;  %s599_s2 = inlined_call_operand.vmem [shape: bf16[128,32], index: 2, kind: input, shape index: {}]   ;;  %s600_s0 = inlined_call_operand.vmem [shape: bf16[16,32], index: 0, kind: input, shape index: {}]   ;;  %s601_s3 = inlined_call_operand.vmem [shape: f32[16,1], index: 3, kind: input, shape index: {}]   ;;  %s602_s4 = inlined_call_operand.vmem [shape: f32[16,1], index: 4, kind: input, shape index: {}]   ;;  %s603_s5 = inlined_call_operand.vmem [shape: f32[16,128], index: 5, kind: output, shape index: {}]  }
   0x1   :  { %390 = vmatprep.subr.bf16.mxu0 %v460_v0  ;;  %v435_v1 = vld [vmem:[%s598_s1] sm:$0xff]   ;;  %410 = vmatprep.subr.bf16.mxu1 %v460_v0  ;;  %v436_v4 = vld [vmem:[%s598_s1 + $0x8] sm:$0xff]   ;;  %v437_v9 = vld [vmem:[%s598_s1 + $0x10] sm:$0xff]  }
   0x2   :  { %406 = vmatprep.mubr.msk.bf16.mxu0 %vm461_vm1, %v460_v0  ;;  %426 = vmatprep.mubr.msk.bf16.mxu1 %vm461_vm1, %v460_v0  ;;  %v99_v2 = vsel %vm94_vm0, %v435_v1, 0  ;;  %v439_v5 = vld [vmem:[%s599_s2] sm:$0xff]   ;;  %v102_v7 = vsel %vm94_vm0, %v436_v4, 0  ;;  %v441_v8 = vld [vmem:[%s599_s2 + $0x8] sm:$0xff]   ;;  %v105_v11 = vsel %vm94_vm0, %v437_v9, 0  ;;  %v443_v12 = vld [vmem:[%s599_s2 + $0x10] sm:$0xff]  }
   0x3   :  { %433 = vset.pattern.permute.xlu0 %v462_v3  ;;  %434 = vset.pattern.permute.xlu1 %v462_v3  ;;  %v226_v6 = vsel %vm94_vm0, %v439_v5, 0  ;;  %v229_v10 = vsel %vm94_vm0, %v441_v8, 0  ;;  %v299_v13 = vld [vmem:[%s601_s3] sm:$0xff]  ;;  %v300_v15 = vld [vmem:[%s601_s3 + $0x8] sm:$0xff]  ;;  %v438_v17 = vld [vmem:[%s598_s1 + $0x18] sm:$0xff]   ;;  %v232_v18 = vsel %vm94_vm0, %v443_v12, 0 }
   0x4   :  { %391 = vmatpush3.bf16.xpose.msra.mxu0 %v99_v2  ;;  %411 = vmatpush3.bf16.xpose.msra.mxu1 %v226_v6  ;;  %v315_v14 = vld [vmem:[%s602_s4] sm:$0xff]  ;;  %v316_v16 = vld [vmem:[%s602_s4 + $0x8] sm:$0xff]  ;;  %v108_v19 = vsel %vm94_vm0, %v438_v17, 0  ;;  %v445_v20 = vld [vmem:[%s599_s2 + $0x18] sm:$0xff]  }
   0x5   :  { %392 = vmatprep.subr.bf16.mxu0 %v460_v0  ;;  %412 = vmatprep.subr.bf16.mxu1 %v460_v0  ;;  %v440_v21 = vld [vmem:[%s598_s1 + $0x20] sm:$0xff]   ;;  %v235_v22 = vsel %vm94_vm0, %v445_v20, 0  ;;  %v442_v25 = vld [vmem:[%s598_s1 + $0x28] sm:$0xff]   ;;  %v444_v29 = vld [vmem:[%s598_s1 + $0x30] sm:$0xff]  }
   0x6   :  { %303 = vperm.xlu0 %433, %v299_v13   ;;  %319 = vperm.xlu1 %434, %v315_v14   ;;  %v111_v23 = vsel %vm94_vm0, %v440_v21, 0  ;;  %v447_v24 = vld [vmem:[%s599_s2 + $0x20] sm:$0xff]   ;;  %v114_v27 = vsel %vm94_vm0, %v442_v25, 0  ;;  %v449_v28 = vld [vmem:[%s599_s2 + $0x28] sm:$0xff]   ;;  %v117_v31 = vsel %vm94_vm0, %v444_v29, 0  ;;  %v450_v32 = vld [vmem:[%s599_s2 + $0x30] sm:$0xff]  }
   0x7   :  { %v238_v26 = vsel %vm94_vm0, %v447_v24, 0  ;;  %v241_v30 = vsel %vm94_vm0, %v449_v28, 0  ;;  %v446_v33 = vld [vmem:[%s598_s1 + $0x38] sm:$0xff]   ;;  %v244_v34 = vsel %vm94_vm0, %v450_v32, 0  ;;  %v448_v38 = vld [vmem:[%s600_s0] sm:$0xff]  }
   0x8   :  { %v120_v35 = vsel %vm94_vm0, %v446_v33, 0  ;;  %v451_v36 = vld [vmem:[%s599_s2 + $0x38] sm:$0xff]  }
   0x9   :  { %v247_v37 = vsel %vm94_vm0, %v451_v36, 0 }
   0xa   :  { %308 = vperm.xlu0 %433, %v300_v15   ;;  %324 = vperm.xlu1 %434, %v316_v16  }
   0xc   :  { %393 = vmatpush3.bf16.xpose.msra.mxu0 %v102_v7  ;;  %413 = vmatpush3.bf16.xpose.msra.mxu1 %v229_v10 }
   0xd   :  { %394 = vmatprep.subr.bf16.mxu0 %v460_v0  ;;  %414 = vmatprep.subr.bf16.mxu1 %v460_v0 }
  0x14   :  { %395 = vmatpush3.bf16.xpose.msra.mxu0 %v105_v11  ;;  %415 = vmatpush3.bf16.xpose.msra.mxu1 %v232_v18 }
  0x15   :  { %396 = vmatprep.subr.bf16.mxu0 %v460_v0  ;;  %416 = vmatprep.subr.bf16.mxu1 %v460_v0 }
  0x1c   :  { %397 = vmatpush3.bf16.xpose.msra.mxu0 %v108_v19  ;;  %417 = vmatpush3.bf16.xpose.msra.mxu1 %v235_v22 }
  0x1d   :  { %398 = vmatprep.subr.bf16.mxu0 %v460_v0  ;;  %418 = vmatprep.subr.bf16.mxu1 %v460_v0 }
  0x24   :  { %399 = vmatpush3.bf16.xpose.msra.mxu0 %v111_v23  ;;  %419 = vmatpush3.bf16.xpose.msra.mxu1 %v238_v26 }
  0x25   :  { %400 = vmatprep.subr.bf16.mxu0 %v460_v0  ;;  %420 = vmatprep.subr.bf16.mxu1 %v460_v0 }
  0x2c   :  { %401 = vmatpush3.bf16.xpose.msra.mxu0 %v114_v27  ;;  %421 = vmatpush3.bf16.xpose.msra.mxu1 %v241_v30 }
  0x2d   :  { %402 = vmatprep.subr.bf16.mxu0 %v460_v0  ;;  %422 = vmatprep.subr.bf16.mxu1 %v460_v0 }
  0x34   :  { %403 = vmatpush3.bf16.xpose.msra.mxu0 %v117_v31  ;;  %423 = vmatpush3.bf16.xpose.msra.mxu1 %v244_v34 }
  0x35   :  { %404 = vmatprep.subr.bf16.mxu0 %v460_v0  ;;  %424 = vmatprep.subr.bf16.mxu1 %v460_v0 }
  0x3c   :  { %405 = vmatpush3.bf16.xpose.msra.mxu0 %v120_v35  ;;  %425 = vmatpush3.bf16.xpose.msra.mxu1 %v247_v37 }
  0x43   :  { %407 = vmatmul.mubr.msk.bf16.vlgmr.msra.gmra.mrb[0].mxu0 %vm94_vm0, %v448_v38  ;;  %427 = vmatmul.mubr.msk.bf16.vlgmr.msra.gmra.mrb[0].mxu1 %vm94_vm0, %v448_v38 }
  0x85   :  { %v304_v39 = vpop.permute.xlu0 %303  ;;  %v320_v57 = vpop.permute.xlu1 %319 }
  0x89   :  { %v309_v43 = vpop.permute.xlu0 %308  ;;  %v325_v59 = vpop.permute.xlu1 %324 }
 0x116   :  { %v156_v40 = vpop.f32.mrb[0].mxu0  ;;  %v283_v48 = vpop.f32.mrb[0].mxu1 }
 0x117   :  { %v311_v41 = vmul.f32 %v304_v39, %v156_v40  ;;  %v408_v42 = vpop.f32.mrb[1].mxu0  ;;  %v428_v50 = vpop.f32.mrb[1].mxu1  ;;  %v327_v61 = vmul.f32 %v320_v57, %v283_v48 }
 0x118   :  { %v159_v44 = vpop.f32.mrb[2].mxu0  ;;  %v286_v51 = vpop.f32.mrb[2].mxu1 }
 0x119   :  { %v370_v45 = vmul.f32 -1.442695, %v311_v41  ;;  %v312_v46 = vmul.f32 %v309_v43, %v159_v44  ;;  %v409_v47 = vpop.f32.mrb[3].mxu0  ;;  %v429_v52 = vpop.f32.mrb[3].mxu1  ;;  %v328_v1 = vmul.f32 %v325_v59, %v286_v51 }
 0x11b   :  { %452 = vpow2.f32 %v370_v45  ;;  %v371_v49 = vmul.f32 -1.442695, %v312_v46 }
 0x11d   :  { %454 = vpow2.f32 %v371_v49 }
 0x125   :  { %v453_v53 = vpop.eup %452 }
 0x126   :  { %v335_v54 = vadd.f32 1.0, %v453_v53 }
 0x127   :  { %v455_v55 = vpop.eup %454 }
 0x128   :  { %456 = vrcp.f32 %v335_v54  ;;  %v336_v56 = vadd.f32 1.0, %v455_v55 }
 0x12a   :  { %458 = vrcp.f32 %v336_v56 }
 0x132   :  { %v457_v58 = vpop.eup %456 }
 0x133   :  { %v341_v60 = vmul.f32 %v457_v58, %v311_v41 }
 0x134   :  { %v459_v62 = vpop.eup %458 }
 0x135   :  { %v342_v63 = vmul.f32 %v459_v62, %v312_v46  ;;  %v343_v0 = vmul.f32 %v341_v60, %v327_v61 }
 0x137   :  { %345 = vst [vmem:[%s603_s5] sm:$0xff] %v343_v0  ;;  %v344_v2 = vmul.f32 %v342_v63, %v328_v1 }
 0x139   :  { %346 = vst [vmem:[%s603_s5 + $0x8] sm:$0xff] %v344_v2 }

// kernel: transformer_forward.33
= control target key start
LH: loop header
LB: loop body
LE: loop exit
PB: predicated region body
PF: predicated region fallthrough
CT: control target
= control target key end

     0   :  { %vm19_vm0 = vcmask 261120   ;;  %v140_v0 = vmov 0.0   ;;  %vm141_vm1 = vmmov 0   ;;  %v142_v2 = vmov 0   ;;  %s190_s1 = inlined_call_operand.vmem [shape: bf16[32,128], index: 1, kind: input, shape index: {}]   ;;  %s191_s2 = inlined_call_operand.vmem [shape: f32[16,1], index: 2, kind: input, shape index: {}]   ;;  %s192_s0 = inlined_call_operand.vmem [shape: bf16[16,128], index: 0, kind: input, shape index: {}]   ;;  %s193_s3 = inlined_call_operand.vmem [shape: f32[16,32], index: 3, kind: output, shape index: {}]  }
   0x1   :  { %125 = vmatprep.subr.bf16.mxu0 %v140_v0  ;;  %v137_v1 = vld [vmem:[%s190_s1] sm:$0xff]   ;;  %129 = vmatprep.mubr.msk.bf16.mxu0 %vm141_vm1, %v140_v0  ;;  %20 = vst.msk [vmem:[#allocation2] sm:$0xff] %vm19_vm0, %v140_v0  ;;  %21 = vst.msk [vmem:[#allocation2 + $0x8] sm:$0xff] %vm19_vm0, %v140_v0  ;;  %v100_v4 = vld [vmem:[%s191_s2 + $0x8] sm:$0xff] }
   0x2   :  { %136 = vset.pattern.permute.xlu0 %v142_v2  ;;  %126 = vmatpush3.bf16.xpose.msra.mxu0 %v137_v1  ;;  %v99_v3 = vld [vmem:[%s191_s2] sm:$0xff]  ;;  %v138_v5 = vld [vmem:[%s190_s1 + $0x8] sm:$0xff]  }
   0x3   :  { %127 = vmatprep.subr.bf16.mxu0 %v140_v0  ;;  %103 = vperm.xlu0 %136, %v99_v3   ;;  %v139_v6 = vld [vmem:[%s192_s0] sm:$0xff]  }
   0x7   :  { %108 = vperm.xlu0 %136, %v100_v4  }
   0x8   :  { %v22_v7 = vld [vmem:[#allocation2] sm:$0xff]  ;;  %v23_v9 = vld [vmem:[#allocation2 + $0x8] sm:$0xff] }
   0xa   :  { %128 = vmatpush3.bf16.xpose.msra.mxu0 %v138_v5 }
  0x11   :  { %130 = vmatmul.mubr.bf16.vlgmr.msra.gmra.mrb[0].mxu0 %v139_v6 }
  0x82   :  { %v104_v15 = vpop.permute.xlu0 %103 }
  0x86   :  { %v109_v18 = vpop.permute.xlu0 %108 }
  0xe4   :  { %v82_v8 = vpop.f32.mrb[0].mxu0 }
  0xe5   :  { %v89_v10 = vadd.f32 %v82_v8, %v22_v7  ;;  %v131_v11 = vpop.f32.mrb[1].mxu0 }
  0xe6   :  { %v85_v12 = vpop.f32.mrb[2].mxu0 }
  0xe7   :  { %92 = vst.msk [vmem:[#allocation2] sm:$0xff] %vm19_vm0, %v89_v10  ;;  %v90_v13 = vadd.f32 %v85_v12, %v23_v9  ;;  %v132_v14 = vpop.f32.mrb[3].mxu0 }
  0xe9   :  { %93 = vst.msk [vmem:[#allocation2 + $0x8] sm:$0xff] %vm19_vm0, %v90_v13 }
  0xee   :  { %v97_v16 = vld [vmem:[#allocation2] sm:$0xff] }
  0xef   :  { %v111_v17 = vmul.f32 %v104_v15, %v97_v16 }
  0xf0   :  { %v98_v19 = vld [vmem:[#allocation2 + $0x8] sm:$0xff] }
  0xf1   :  { %113 = vst.msk [vmem:[%s193_s3] sm:$0xff] %vm19_vm0, %v111_v17  ;;  %v112_v20 = vmul.f32 %v109_v18, %v98_v19 }
  0xf3   :  { %114 = vst.msk [vmem:[%s193_s3 + $0x8] sm:$0xff] %vm19_vm0, %v112_v20 }

// kernel: transformer_forward.45
= control target key start
LH: loop header
LB: loop body
LE: loop exit
PB: predicated region body
PF: predicated region fallthrough
CT: control target
= control target key end

     0   :  { %vm20_vm0 = vcmask 261120   ;;  %s365_s0 = inlined_call_operand.vmem [shape: f32[16,32], index: 0, kind: input, shape index: {}]   ;;  %s366_s1 = inlined_call_operand.vmem [shape: f32[1,32], index: 1, kind: input, shape index: {}]   ;;  %s367_s2 = inlined_call_operand.vmem [shape: f32[64,32], index: 2, kind: input, shape index: {}]   ;;  %s368_s3 = inlined_call_operand.hbm [shape: f32[16,64], index: 3, kind: output, shape index: {}]  }
   0x1   :  { %v15_v0 = vld [vmem:[%s365_s0] sm:$0xff]  ;;  %v16_v1 = vld [vmem:[%s365_s0 + $0x8] sm:$0xff]  ;;  %vm305_vm1 = vmpackc.low %vm20_vm0, %vm20_vm0 }
   0x2   :  { %v44_v2 = vld [vmem:[%s367_s2] sm:$0xff]  ;;  %v18_v3 = vmul.f32 %v15_v0, %v15_v0  ;;  %v19_v5 = vmul.f32 %v16_v1, %v16_v1  ;;  %v45_v6 = vld [vmem:[%s367_s2 + $0x8] sm:$0xff]  ;;  %v46_v7 = vld [vmem:[%s367_s2 + $0x10] sm:$0xff] }
   0x3   :  { %v216_v8 = vpack.c.bf16 %v45_v6, %v44_v2  ;;  %v47_v9 = vld [vmem:[%s367_s2 + $0x18] sm:$0xff] }
   0x4   :  { %8 = vsyncpa [#allocation3], 0  ;;  %v21_v10 = vsel %vm20_vm0, %v18_v3, 0.0  ;;  %v222_v11 = vpack.c.bf16 %v47_v9, %v46_v7  ;;  %v24_v12 = vsel %vm20_vm0, %v19_v5, 0.0  ;;  %v48_v13 = vld [vmem:[%s367_s2 + $0x20] sm:$0xff]  ;;  %v49_v14 = vld [vmem:[%s367_s2 + $0x28] sm:$0xff] }
   0x5   :  { %22 = vadd.xlane.f32.xlu0 %v21_v10  ;;  %218 = vmatprep.subr.msk.bf16.mxu0 %vm305_vm1, %v216_v8  ;;  %v228_v15 = vpack.c.bf16 %v49_v14, %v48_v13  ;;  %v50_v16 = vld [vmem:[%s367_s2 + $0x30] sm:$0xff]  ;;  %v51_v17 = vld [vmem:[%s367_s2 + $0x38] sm:$0xff]  ;;  %v176_v26 = vld [vmem:[%s366_s1] ss:$0 sm:$0xff]  ;;  %s271_s2 = smov [#allocation2]   ;;  %vm157_vm2 = vcmask 523264  }
   0x6   :  { %221 = vmatpush3.bf16.xpose.msk.msra.mxu0 %vm305_vm1, %v216_v8  ;;  %v234_v18 = vpack.c.bf16 %v51_v17, %v50_v16  ;;  %s165_s6 = sshll.u32 %s271_s2, 4  ;;  %s166_s6 = int_to_ptr.vmem [resolvable:$true] %s165_s6 }
   0x7   :  { %224 = vmatprep.subr.msk.bf16.mxu0 %vm305_vm1, %v222_v11  ;;  %s247_s7 = scalar_lea.vmem %s166_s6, 256  ;;  %p252_p1 = scmp.lt.s32.totalorder %s166_s6, %s166_s6 }
   0x8   :  { %p248_p0 = scmp.ne.s32.totalorder %s166_s6, %s247_s7  ;;  %p253_p2 = scmp.lt.s32.totalorder %s247_s7, %s247_s7 }
   0x9   :  { %25 = vadd.xlane.f32.xlu0 %v24_v12 }
   0xa   :  { %p254_p3 = por %p253_p2, %p252_p1 }
   0xc   :  { %p255_p4 = pnand %p254_p3, %p248_p0 }
   0xe   :  { %227 = vmatpush3.bf16.xpose.msk.msra.mxu0 %vm305_vm1, %v222_v11 }
   0xf   :  { %230 = vmatprep.subr.msk.bf16.mxu0 %vm305_vm1, %v228_v15 }
  0x16   :  { %233 = vmatpush3.bf16.xpose.msk.msra.mxu0 %vm305_vm1, %v228_v15 }
  0x17   :  { %236 = vmatprep.subr.msk.bf16.mxu0 %vm305_vm1, %v234_v18 }
  0x1e   :  { %239 = vmatpush3.bf16.xpose.msk.msra.mxu0 %vm305_vm1, %v234_v18 }
  0x92   :  { %v23_v19 = vpop.xlane.xlu0 %22 }
  0x93   :  { %v28_v20 = vmul.f32 0.03125, %v23_v19 }
  0x95   :  { %v30_v21 = vadd.f32 1e-06, %v28_v20 }
  0x96   :  { %v26_v22 = vpop.xlane.xlu0 %25 }
  0x97   :  { %243 = vrsqrt.f32 %v30_v21  ;;  %v29_v23 = vmul.f32 0.03125, %v26_v22 }
  0x99   :  { %v31_v24 = vadd.f32 1e-06, %v29_v23 }
  0x9b   :  { %245 = vrsqrt.f32 %v31_v24 }
  0xa1   :  { %v244_v25 = vpop.eup %243 }
  0xa2   :  { %v34_v27 = vmul.f32 %v244_v25, %v15_v0 }
  0xa4   :  { %v42_v28 = vmul.f32 %v176_v26, %v34_v27 }
  0xa5   :  { %v246_v29 = vpop.eup %245 }
  0xa6   :  { %v35_v30 = vmul.f32 %v246_v29, %v16_v1  ;;  %213 = vmatprep.mubr.msk.f32.mxu0 %vm20_vm0, %v42_v28 }
  0xa8   :  { %v43_v31 = vmul.f32 %v176_v26, %v35_v30 }
  0xaa   :  { %214 = vmatmul.mubr.msk.f32.vlgmr.msra.gmra.mrb[0].mxu0 %vm20_vm0, %v43_v31 }
 0x17d   :  { %v215_v32 = vpop.f32.mrb[0].mxu0 }
 0x17e   :  { %159 = vst.msk [vmem:[#allocation2 + $0x8] sm:$0xff] %vm157_vm2, %v215_v32  ;;  %v148_v33 = vpop.f32.mrb[1].mxu0 }
 0x17f   :  { %158 = vst.msk [vmem:[#allocation2] sm:$0xff] %vm157_vm2, %v148_v33 }
 0x180   :  { %258 = shalt.err (!%p255_p4)
}
 0x181   :  { %s259_s9 = scalar_lea.hbm %s368_s3, 256 }
 0x182   :  { %p260_p5 = scmp.ne.s32.totalorder %s368_s3, %s259_s9  ;;  %p263_p6 = scmp.lt.u32.totalorder %s259_s9, %s368_s3 }
 0x184   :  { %p265_p7 = pnand %p263_p6, %p260_p5 }
 0x186   :  { %268 = shalt.err (!%p265_p7)
}
 0x187   :  { %s272_s14 = smov 128   ;;  %s273_s15 = smov 8  }
 0x188   :  { %171 = dma.vmem_to_hbm [thread:$0]  %s166_s6, 256, %s368_s3, [#allocation3], %s272_s14, %s272_s14, %s273_s15  }
 0x189   :  { %269 = dma.done.wait [#allocation3], 256  }
 0x18a   :  { %270 = vsyncadd [#allocation3], 4294967040 }
 0x18b   :  { %175 = vsyncpa [#allocation3], 1 }

</bundles_post_ra>
